<compile_context>
chip_gen: v5e
topology: v5e:2x2
jax: 0.10.0
libtpu: 0.0.40
codegen_flags: <defaults>
</compile_context>

<pallas_src>
import functools

import jax
import jax.numpy as jnp
from jax.experimental import pallas as pl
from jax.experimental.pallas import tpu as pltpu


def _inception_kernel(x_ref, mask_ref,
                      wpw_ref, bpw_ref,
                      w1b_ref, b1b_ref,
                      w2b_ref, b2b_ref,
                      w2c_ref, b2c_ref,
                      out_ref, *, W, C):
    """One (n, depth-chunk) block.  x_ref: (C, P), out_ref: (8C, P)."""
    cdt = wpw_ref.dtype                        # compute dtype for MXU operands
    x = x_ref[...].astype(cdt)                 # (C, P)
    P = x.shape[-1]
    masks = mask_ref[...]                      # (9, P) 0/1 border masks

    def relu6(v):
        return jnp.clip(v, 0.0, 6.0)

    def conv3x3(a, w_ref, b_ref):
        # (1,3,3) conv with padding (0,1,1): im2col + one wide-K MXU matmul.
        # Taps are lane rolls along the flattened pixel axis; every position
        # where a tap crosses an image border (hence also every roll wrap)
        # is zeroed by the precomputed masks.
        taps = []
        for ky in range(3):
            for kx in range(3):
                dy, dx = ky - 1, kx - 1
                off = dy * W + dx
                t = a if off == 0 else pltpu.roll(a, shift=(-off) % P, axis=1)
                idx = ky * 3 + kx
                if idx != 4:                   # center tap needs no mask
                    t = t * masks[idx:idx + 1, :]
                taps.append(t)
        patches = jnp.concatenate(taps, axis=0)             # (9*cin, P)
        return jnp.dot(w_ref[...], patches,
                       preferred_element_type=jnp.float32) + b_ref[...]

    # Fused 1x1 convolutions (single MXU push); sublane layout of y:
    #   [branch0 (2C) | branch1a (2C) | downsample (8C) | branch2a (C)]
    y = jnp.dot(wpw_ref[...], x, preferred_element_type=jnp.float32) + bpw_ref[...]

    od = out_ref.dtype
    # branch0 + its residual slice -> out rows [0, 2C)
    out_ref[0:2 * C, :] = relu6(relu6(y[0:2 * C]) + y[4 * C:6 * C]).astype(od)

    # branch1: one (1,3,3) conv -> out rows [2C, 6C)
    b1a = relu6(y[2 * C:4 * C]).astype(cdt)
    b1 = relu6(conv3x3(b1a, w1b_ref, b1b_ref))
    out_ref[2 * C:6 * C, :] = relu6(b1 + y[6 * C:10 * C]).astype(od)

    # branch2: two (1,3,3) convs -> out rows [6C, 8C)
    b2a = relu6(y[12 * C:13 * C]).astype(cdt)
    t2 = relu6(conv3x3(b2a, w2b_ref, b2b_ref)).astype(cdt)
    b2 = relu6(conv3x3(t2, w2c_ref, b2c_ref))
    out_ref[6 * C:8 * C, :] = relu6(b2 + y[10 * C:12 * C]).astype(od)


def inception_block_space(x_ncdhw, packed_params, *, block_bytes=4 << 20):
    """Wrapper: NCDHW in, NCDHW out (planes = 8 * inplanes channels)."""
    N, C, D, H, W = x_ncdhw.shape
    planes = 8 * C
    HW = H * W
    cdt = packed_params[0].dtype

    # Depth chunk per grid step: whole (h, w) slices, constrained only by a
    # rough VMEM working-set estimate (~96*C f32 per pixel) and the (8,128)
    # rule on the block's last dim (td*HW multiple of 128, or the full dim).
    per_slice = HW * C * 4 * 96
    budget = max(1, block_bytes // max(per_slice, 1))
    cands = [t for t in range(1, D + 1)
             if D % t == 0 and (t == D or (t * HW) % 128 == 0)]
    fitting = [t for t in cands if t <= budget]
    td = max(fitting) if fitting else min(cands)
    P = td * HW

    # Free reshapes: NCDHW -> (N, C, D*H*W); output back to (N, 8C, D, H, W).
    x = x_ncdhw.reshape(N, C, D * HW)

    # Precomputed 0/1 border masks for the nine (1,3,3) conv taps.
    yv = jnp.repeat(jnp.arange(H, dtype=jnp.int32), W)
    xv = jnp.tile(jnp.arange(W, dtype=jnp.int32), H)
    rows = []
    for ky in range(3):
        for kx in range(3):
            dy, dx = ky - 1, kx - 1
            m = jnp.ones((HW,), jnp.float32)
            if dy == -1:
                m = m * (yv >= 1)
            elif dy == 1:
                m = m * (yv <= H - 2)
            if dx == -1:
                m = m * (xv >= 1)
            elif dx == 1:
                m = m * (xv <= W - 2)
            rows.append(m)
    mask = jnp.tile(jnp.stack(rows, axis=0), (1, td)).astype(cdt)   # (9, P)

    def full_spec(a):
        return pl.BlockSpec(a.shape, lambda *_: (0,) * a.ndim)

    kernel = functools.partial(_inception_kernel, W=W, C=C)

    out_flat = pl.pallas_call(
        kernel,
        out_shape=jax.ShapeDtypeStruct((N, planes, D * HW), x_ncdhw.dtype),
        grid_spec=pltpu.PrefetchScalarGridSpec(
            num_scalar_prefetch=0,
            grid=(N, D // td),
            in_specs=[pl.BlockSpec((None, C, P), lambda n, d: (n, 0, d)),
                      pl.BlockSpec((9, P), lambda n, d: (0, 0))]
                     + [full_spec(a) for a in packed_params],
            out_specs=pl.BlockSpec((None, planes, P), lambda n, d: (n, 0, d)),
        ),
        compiler_params=pltpu.CompilerParams(
            dimension_semantics=("parallel", "parallel")),
    )(x, mask, *packed_params)

    return out_flat.reshape(N, planes, D, H, W)


def make_params(key, inplanes):
    """Deterministic synthetic folded Conv+BN weights (inference-mode BN).
    1x1 convs: (cout, cin); (1,3,3) convs: (cout, cin, 3, 3); biases (cout,)."""
    C = inplanes
    planes = 8 * C
    eps = 1e-5

    def bn(k, ch):
        kg, kb, km, kv = jax.random.split(k, 4)
        gamma = jax.random.uniform(kg, (ch,), jnp.float32, 0.5, 1.5)
        beta = 0.1 * jax.random.normal(kb, (ch,), jnp.float32)
        mean = 0.1 * jax.random.normal(km, (ch,), jnp.float32)
        var = jax.random.uniform(kv, (ch,), jnp.float32, 0.5, 1.5)
        scale = gamma / jnp.sqrt(var + eps)
        bias = beta - mean * scale
        return scale, bias

    def conv1x1_bn(k, cin, cout):
        kw, kbn = jax.random.split(k)
        w = jax.random.normal(kw, (cout, cin), jnp.float32) / jnp.sqrt(cin)
        scale, bias = bn(kbn, cout)
        return w * scale[:, None], bias

    def conv3x3_bn(k, cin, cout):
        kw, kbn = jax.random.split(k)
        w = jax.random.normal(kw, (cout, cin, 3, 3), jnp.float32) / jnp.sqrt(9 * cin)
        scale, bias = bn(kbn, cout)
        return w * scale[:, None, None, None], bias

    ks = jax.random.split(key, 7)
    w0, b0 = conv1x1_bn(ks[0], C, 2 * C)
    w1a, b1a = conv1x1_bn(ks[1], C, 2 * C)
    w1b, b1b = conv3x3_bn(ks[2], 2 * C, 4 * C)
    w2a, b2a = conv1x1_bn(ks[3], C, C)
    w2b, b2b = conv3x3_bn(ks[4], C, 2 * C)
    w2c, b2c = conv3x3_bn(ks[5], 2 * C, 2 * C)
    wd, bd = conv1x1_bn(ks[6], C, planes)
    return (w0, b0, w1a, b1a, w1b, b1b, w2a, b2a, w2b, b2b, w2c, b2c, wd, bd)


def pack_params(params, dtype=jnp.float32):
    """Re-pack per-conv folded params into the kernel layout:
       * one fused (13C, C) pointwise weight / (13C, 1) f32 bias with sublane
         order [branch0 | branch1a | downsample | branch2a],
       * (cout, 9*cin) im2col weights (K order = ky, kx, cin) for the three
         (1,3,3) convs, each with an f32 (cout, 1) bias.
    Use dtype=jnp.bfloat16 for bf16 MXU operands on v6e/v7x."""
    (w0, b0, w1a, b1a, w1b, b1b, w2a, b2a, w2b, b2b, w2c, b2c, wd, bd) = params
    wpw = jnp.concatenate([w0, w1a, wd, w2a], axis=0).astype(dtype)      # (13C, C)
    bpw = jnp.concatenate([b0, b1a, bd, b2a], axis=0)[:, None]
    bpw = bpw.astype(jnp.float32)                                        # (13C, 1)

    def im2col_w(w):        # (cout, cin, 3, 3) -> (cout, 9*cin)
        cout, cin = w.shape[0], w.shape[1]
        return w.transpose(0, 2, 3, 1).reshape(cout, 9 * cin).astype(dtype)

    def col_b(b):
        return b[:, None].astype(jnp.float32)

    return (wpw, bpw,
            im2col_w(w1b), col_b(b1b),
            im2col_w(w2b), col_b(b2b),
            im2col_w(w2c), col_b(b2c))


def ref_forward(x_ncdhw, params):
    """Independent pure-JAX reference (lax conv, NHWC)."""
    N, C, D, H, W = x_ncdhw.shape
    x = jnp.transpose(x_ncdhw, (0, 2, 3, 4, 1)).reshape(N * D, H, W, C)
    x = x.astype(jnp.float32)
    (w0, b0, w1a, b1a, w1b, b1b, w2a, b2a, w2b, b2b, w2c, b2c, wd, bd) = params
    relu6 = lambda v: jnp.clip(v, 0.0, 6.0)

    def c1(a, w, b):
        return jnp.einsum('bhwc,oc->bhwo', a, w) + b.reshape(1, 1, 1, -1)

    def c3(a, w, b):
        y = jax.lax.conv_general_dilated(
            a, w.transpose(2, 3, 1, 0), window_strides=(1, 1), padding='SAME',
            dimension_numbers=('NHWC', 'HWIO', 'NHWC'))
        return y + b.reshape(1, 1, 1, -1)

    x0 = relu6(c1(x, w0, b0))
    x1 = relu6(c3(relu6(c1(x, w1a, b1a)), w1b, b1b))
    x2 = relu6(c3(relu6(c3(relu6(c1(x, w2a, b2a)), w2b, b2b)), w2c, b2c))
    res = c1(x, wd, bd)
    out = relu6(jnp.concatenate([x0, x1, x2], axis=-1) + res)
    return out.reshape(N, D, H, W, 8 * C).transpose(0, 4, 1, 2, 3)


if __name__ == "__main__":
    key = jax.random.PRNGKey(0)
    kx, kp = jax.random.split(key)

    # small shapes: inplanes=4, planes=32, batch=2, depth=3, spatial=8x8
    N, C, D, H, W = 2, 4, 3, 8, 8
    x = jax.random.normal(kx, (N, C, D, H, W), jnp.float32)
    params = make_params(kp, C)

    out = inception_block_space(x, pack_params(params))
    out = jax.block_until_ready(out)

    ref = ref_forward(x, params)
    assert out.shape == (N, 8 * C, D, H, W), out.shape
    err = float(jnp.max(jnp.abs(out - ref)))
    if err > 5e-2:
        raise AssertionError(f"mismatch vs reference: max abs err {err}")

    print("KERNEL_OK")
</pallas_src>

<mosaic_0001>
module attributes {stable_mosaic.version = 11 : i64} {
  func.func @_inception_kernel(%arg0: i32, %arg1: i32, %arg2: memref<1x4x192xf32, #tpu.memory_space<vmem>>, %arg3: memref<9x192xf32, #tpu.memory_space<vmem>>, %arg4: memref<52x4xf32, #tpu.memory_space<vmem>>, %arg5: memref<52x1xf32, #tpu.memory_space<vmem>>, %arg6: memref<16x72xf32, #tpu.memory_space<vmem>>, %arg7: memref<16x1xf32, #tpu.memory_space<vmem>>, %arg8: memref<8x36xf32, #tpu.memory_space<vmem>>, %arg9: memref<8x1xf32, #tpu.memory_space<vmem>>, %arg10: memref<8x72xf32, #tpu.memory_space<vmem>>, %arg11: memref<8x1xf32, #tpu.memory_space<vmem>>, %arg12: memref<1x32x192xf32, #tpu.memory_space<vmem>>) attributes {dimension_semantics = [#tpu.dimension_semantics<parallel>, #tpu.dimension_semantics<parallel>], iteration_bounds = array<i64: 2, 1>, scalar_prefetch = 0 : i64, scratch_operands = 0 : i64, tpu.core_type = #tpu.core_type<tc>, window_params = [{transform_indices = @transform_0, window_bounds = array<i64: 1, 4, 192>}, {pipeline_mode = #tpu.pipeline_mode<synchronous>, transform_indices = @transform_1, window_bounds = array<i64: 9, 192>}, {pipeline_mode = #tpu.pipeline_mode<synchronous>, transform_indices = @transform_2, window_bounds = array<i64: 52, 4>}, {pipeline_mode = #tpu.pipeline_mode<synchronous>, transform_indices = @transform_3, window_bounds = array<i64: 52, 1>}, {pipeline_mode = #tpu.pipeline_mode<synchronous>, transform_indices = @transform_4, window_bounds = array<i64: 16, 72>}, {pipeline_mode = #tpu.pipeline_mode<synchronous>, transform_indices = @transform_5, window_bounds = array<i64: 16, 1>}, {pipeline_mode = #tpu.pipeline_mode<synchronous>, transform_indices = @transform_6, window_bounds = array<i64: 8, 36>}, {pipeline_mode = #tpu.pipeline_mode<synchronous>, transform_indices = @transform_7, window_bounds = array<i64: 8, 1>}, {pipeline_mode = #tpu.pipeline_mode<synchronous>, transform_indices = @transform_8, window_bounds = array<i64: 8, 72>}, {pipeline_mode = #tpu.pipeline_mode<synchronous>, transform_indices = @transform_9, window_bounds = array<i64: 8, 1>}, {transform_indices = @transform_10, window_bounds = array<i64: 1, 32, 192>}]} {
    %c0 = arith.constant 0 : index
    %c0_0 = arith.constant 0 : index
    %c0_1 = arith.constant 0 : index
    %0 = vector.load %arg2[%c0, %c0_0, %c0_1] : memref<1x4x192xf32, #tpu.memory_space<vmem>>, vector<1x4x192xf32>
    %1 = vector.shape_cast %0 : vector<1x4x192xf32> to vector<4x192xf32>
    %c0_2 = arith.constant 0 : index
    %c0_3 = arith.constant 0 : index
    %2 = vector.load %arg3[%c0_2, %c0_3] : memref<9x192xf32, #tpu.memory_space<vmem>>, vector<9x192xf32>
    %c0_4 = arith.constant 0 : index
    %c0_5 = arith.constant 0 : index
    %3 = vector.load %arg4[%c0_4, %c0_5] : memref<52x4xf32, #tpu.memory_space<vmem>>, vector<52x4xf32>
    %cst = arith.constant dense<0.000000e+00> : vector<52x192xf32>
    %4 = tpu.matmul %3, %1, %cst {dimension_numbers = #tpu.dot_dimension_numbers<[1], [0], [0], [1], [0, 0, 1, 1], [], []>} : vector<52x4xf32>, vector<4x192xf32>, vector<52x192xf32> -> vector<52x192xf32>
    %c0_6 = arith.constant 0 : index
    %c0_7 = arith.constant 0 : index
    %5 = vector.load %arg5[%c0_6, %c0_7] : memref<52x1xf32, #tpu.memory_space<vmem>>, vector<52x1xf32>
    %6 = vector.broadcast %5 : vector<52x1xf32> to vector<52x192xf32>
    %7 = arith.addf %4, %6 : vector<52x192xf32>
    %8 = vector.extract_strided_slice %7 {offsets = [0, 0], sizes = [8, 192], strides = [1, 1]} : vector<52x192xf32> to vector<8x192xf32>
    %cst_8 = arith.constant 0.000000e+00 : f32
    %cst_9 = arith.constant 6.000000e+00 : f32
    %9 = vector.broadcast %cst_8 : f32 to vector<8x192xf32>
    %10 = arith.maximumf %9, %8 : vector<8x192xf32>
    %11 = vector.broadcast %cst_9 : f32 to vector<8x192xf32>
    %12 = arith.minimumf %11, %10 : vector<8x192xf32>
    %13 = vector.extract_strided_slice %7 {offsets = [16, 0], sizes = [8, 192], strides = [1, 1]} : vector<52x192xf32> to vector<8x192xf32>
    %14 = arith.addf %12, %13 : vector<8x192xf32>
    %cst_10 = arith.constant 0.000000e+00 : f32
    %cst_11 = arith.constant 6.000000e+00 : f32
    %15 = vector.broadcast %cst_10 : f32 to vector<8x192xf32>
    %16 = arith.maximumf %15, %14 : vector<8x192xf32>
    %17 = vector.broadcast %cst_11 : f32 to vector<8x192xf32>
    %18 = arith.minimumf %17, %16 : vector<8x192xf32>
    %c0_12 = arith.constant 0 : index
    %c0_13 = arith.constant 0 : index
    %c0_14 = arith.constant 0 : index
    %19 = vector.load %arg12[%c0_12, %c0_13, %c0_14] : memref<1x32x192xf32, #tpu.memory_space<vmem>>, vector<1x8x192xf32>
    %20 = vector.shape_cast %19 : vector<1x8x192xf32> to vector<8x192xf32>
    %21 = vector.shape_cast %18 : vector<8x192xf32> to vector<1x8x192xf32>
    tpu.vector_store %arg12[%c0_12, %c0_13, %c0_14], %21 {strides = array<i32>} : memref<1x32x192xf32, #tpu.memory_space<vmem>>, vector<1x8x192xf32>,
    %22 = vector.extract_strided_slice %7 {offsets = [8, 0], sizes = [8, 192], strides = [1, 1]} : vector<52x192xf32> to vector<8x192xf32>
    %cst_15 = arith.constant 0.000000e+00 : f32
    %cst_16 = arith.constant 6.000000e+00 : f32
    %23 = vector.broadcast %cst_15 : f32 to vector<8x192xf32>
    %24 = arith.maximumf %23, %22 : vector<8x192xf32>
    %25 = vector.broadcast %cst_16 : f32 to vector<8x192xf32>
    %26 = arith.minimumf %25, %24 : vector<8x192xf32>
    %c9_i32 = arith.constant 9 : i32
    %27 = tpu.dynamic_rotate %26 by %c9_i32 dim 1 : vector<8x192xf32>, i32 -> vector<8x192xf32>
    %28 = vector.extract_strided_slice %2 {offsets = [0, 0], sizes = [1, 192], strides = [1, 1]} : vector<9x192xf32> to vector<1x192xf32>
    %29 = vector.broadcast %28 : vector<1x192xf32> to vector<8x192xf32>
    %30 = arith.mulf %27, %29 : vector<8x192xf32>
    %c8_i32 = arith.constant 8 : i32
    %31 = tpu.dynamic_rotate %26 by %c8_i32 dim 1 : vector<8x192xf32>, i32 -> vector<8x192xf32>
    %32 = vector.extract_strided_slice %2 {offsets = [1, 0], sizes = [1, 192], strides = [1, 1]} : vector<9x192xf32> to vector<1x192xf32>
    %33 = vector.broadcast %32 : vector<1x192xf32> to vector<8x192xf32>
    %34 = arith.mulf %31, %33 : vector<8x192xf32>
    %c7_i32 = arith.constant 7 : i32
    %35 = tpu.dynamic_rotate %26 by %c7_i32 dim 1 : vector<8x192xf32>, i32 -> vector<8x192xf32>
    %36 = vector.extract_strided_slice %2 {offsets = [2, 0], sizes = [1, 192], strides = [1, 1]} : vector<9x192xf32> to vector<1x192xf32>
    %37 = vector.broadcast %36 : vector<1x192xf32> to vector<8x192xf32>
    %38 = arith.mulf %35, %37 : vector<8x192xf32>
    %c1_i32 = arith.constant 1 : i32
    %39 = tpu.dynamic_rotate %26 by %c1_i32 dim 1 : vector<8x192xf32>, i32 -> vector<8x192xf32>
    %40 = vector.extract_strided_slice %2 {offsets = [3, 0], sizes = [1, 192], strides = [1, 1]} : vector<9x192xf32> to vector<1x192xf32>
    %41 = vector.broadcast %40 : vector<1x192xf32> to vector<8x192xf32>
    %42 = arith.mulf %39, %41 : vector<8x192xf32>
    %c191_i32 = arith.constant 191 : i32
    %43 = tpu.dynamic_rotate %26 by %c191_i32 dim 1 : vector<8x192xf32>, i32 -> vector<8x192xf32>
    %44 = vector.extract_strided_slice %2 {offsets = [5, 0], sizes = [1, 192], strides = [1, 1]} : vector<9x192xf32> to vector<1x192xf32>
    %45 = vector.broadcast %44 : vector<1x192xf32> to vector<8x192xf32>
    %46 = arith.mulf %43, %45 : vector<8x192xf32>
    %c185_i32 = arith.constant 185 : i32
    %47 = tpu.dynamic_rotate %26 by %c185_i32 dim 1 : vector<8x192xf32>, i32 -> vector<8x192xf32>
    %48 = vector.extract_strided_slice %2 {offsets = [6, 0], sizes = [1, 192], strides = [1, 1]} : vector<9x192xf32> to vector<1x192xf32>
    %49 = vector.broadcast %48 : vector<1x192xf32> to vector<8x192xf32>
    %50 = arith.mulf %47, %49 : vector<8x192xf32>
    %c184_i32 = arith.constant 184 : i32
    %51 = tpu.dynamic_rotate %26 by %c184_i32 dim 1 : vector<8x192xf32>, i32 -> vector<8x192xf32>
    %52 = vector.extract_strided_slice %2 {offsets = [7, 0], sizes = [1, 192], strides = [1, 1]} : vector<9x192xf32> to vector<1x192xf32>
    %53 = vector.broadcast %52 : vector<1x192xf32> to vector<8x192xf32>
    %54 = arith.mulf %51, %53 : vector<8x192xf32>
    %c183_i32 = arith.constant 183 : i32
    %55 = tpu.dynamic_rotate %26 by %c183_i32 dim 1 : vector<8x192xf32>, i32 -> vector<8x192xf32>
    %56 = vector.extract_strided_slice %2 {offsets = [8, 0], sizes = [1, 192], strides = [1, 1]} : vector<9x192xf32> to vector<1x192xf32>
    %57 = vector.broadcast %56 : vector<1x192xf32> to vector<8x192xf32>
    %58 = arith.mulf %55, %57 : vector<8x192xf32>
    %59 = tpu.concatenate %30, %34, %38, %42, %26, %46, %50, %54, %58 in 0 : vector<8x192xf32>, vector<8x192xf32>, vector<8x192xf32>, vector<8x192xf32>, vector<8x192xf32>, vector<8x192xf32>, vector<8x192xf32>, vector<8x192xf32>, vector<8x192xf32> -> vector<72x192xf32>
    %c0_17 = arith.constant 0 : index
    %c0_18 = arith.constant 0 : index
    %60 = vector.load %arg6[%c0_17, %c0_18] : memref<16x72xf32, #tpu.memory_space<vmem>>, vector<16x72xf32>
    %cst_19 = arith.constant dense<0.000000e+00> : vector<16x192xf32>
    %61 = tpu.matmul %60, %59, %cst_19 {dimension_numbers = #tpu.dot_dimension_numbers<[1], [0], [0], [1], [0, 0, 1, 1], [], []>} : vector<16x72xf32>, vector<72x192xf32>, vector<16x192xf32> -> vector<16x192xf32>
    %c0_20 = arith.constant 0 : index
    %c0_21 = arith.constant 0 : index
    %62 = vector.load %arg7[%c0_20, %c0_21] : memref<16x1xf32, #tpu.memory_space<vmem>>, vector<16x1xf32>
    %63 = vector.broadcast %62 : vector<16x1xf32> to vector<16x192xf32>
    %64 = arith.addf %61, %63 : vector<16x192xf32>
    %cst_22 = arith.constant 0.000000e+00 : f32
    %cst_23 = arith.constant 6.000000e+00 : f32
    %65 = vector.broadcast %cst_22 : f32 to vector<16x192xf32>
    %66 = arith.maximumf %65, %64 : vector<16x192xf32>
    %67 = vector.broadcast %cst_23 : f32 to vector<16x192xf32>
    %68 = arith.minimumf %67, %66 : vector<16x192xf32>
    %69 = vector.extract_strided_slice %7 {offsets = [24, 0], sizes = [16, 192], strides = [1, 1]} : vector<52x192xf32> to vector<16x192xf32>
    %70 = arith.addf %68, %69 : vector<16x192xf32>
    %cst_24 = arith.constant 0.000000e+00 : f32
    %cst_25 = arith.constant 6.000000e+00 : f32
    %71 = vector.broadcast %cst_24 : f32 to vector<16x192xf32>
    %72 = arith.maximumf %71, %70 : vector<16x192xf32>
    %73 = vector.broadcast %cst_25 : f32 to vector<16x192xf32>
    %74 = arith.minimumf %73, %72 : vector<16x192xf32>
    %c0_26 = arith.constant 0 : index
    %c8 = arith.constant 8 : index
    %c0_27 = arith.constant 0 : index
    %75 = vector.load %arg12[%c0_26, %c8, %c0_27] : memref<1x32x192xf32, #tpu.memory_space<vmem>>, vector<1x16x192xf32>
    %76 = vector.shape_cast %75 : vector<1x16x192xf32> to vector<16x192xf32>
    %77 = vector.shape_cast %74 : vector<16x192xf32> to vector<1x16x192xf32>
    tpu.vector_store %arg12[%c0_26, %c8, %c0_27], %77 {strides = array<i32>} : memref<1x32x192xf32, #tpu.memory_space<vmem>>, vector<1x16x192xf32>,
    %78 = vector.extract_strided_slice %7 {offsets = [48, 0], sizes = [4, 192], strides = [1, 1]} : vector<52x192xf32> to vector<4x192xf32>
    %cst_28 = arith.constant 0.000000e+00 : f32
    %cst_29 = arith.constant 6.000000e+00 : f32
    %79 = vector.broadcast %cst_28 : f32 to vector<4x192xf32>
    %80 = arith.maximumf %79, %78 : vector<4x192xf32>
    %81 = vector.broadcast %cst_29 : f32 to vector<4x192xf32>
    %82 = arith.minimumf %81, %80 : vector<4x192xf32>
    %c9_i32_30 = arith.constant 9 : i32
    %83 = tpu.dynamic_rotate %82 by %c9_i32_30 dim 1 : vector<4x192xf32>, i32 -> vector<4x192xf32>
    %84 = vector.extract_strided_slice %2 {offsets = [0, 0], sizes = [1, 192], strides = [1, 1]} : vector<9x192xf32> to vector<1x192xf32>
    %85 = vector.broadcast %84 : vector<1x192xf32> to vector<4x192xf32>
    %86 = arith.mulf %83, %85 : vector<4x192xf32>
    %c8_i32_31 = arith.constant 8 : i32
    %87 = tpu.dynamic_rotate %82 by %c8_i32_31 dim 1 : vector<4x192xf32>, i32 -> vector<4x192xf32>
    %88 = vector.extract_strided_slice %2 {offsets = [1, 0], sizes = [1, 192], strides = [1, 1]} : vector<9x192xf32> to vector<1x192xf32>
    %89 = vector.broadcast %88 : vector<1x192xf32> to vector<4x192xf32>
    %90 = arith.mulf %87, %89 : vector<4x192xf32>
    %c7_i32_32 = arith.constant 7 : i32
    %91 = tpu.dynamic_rotate %82 by %c7_i32_32 dim 1 : vector<4x192xf32>, i32 -> vector<4x192xf32>
    %92 = vector.extract_strided_slice %2 {offsets = [2, 0], sizes = [1, 192], strides = [1, 1]} : vector<9x192xf32> to vector<1x192xf32>
    %93 = vector.broadcast %92 : vector<1x192xf32> to vector<4x192xf32>
    %94 = arith.mulf %91, %93 : vector<4x192xf32>
    %c1_i32_33 = arith.constant 1 : i32
    %95 = tpu.dynamic_rotate %82 by %c1_i32_33 dim 1 : vector<4x192xf32>, i32 -> vector<4x192xf32>
    %96 = vector.extract_strided_slice %2 {offsets = [3, 0], sizes = [1, 192], strides = [1, 1]} : vector<9x192xf32> to vector<1x192xf32>
    %97 = vector.broadcast %96 : vector<1x192xf32> to vector<4x192xf32>
    %98 = arith.mulf %95, %97 : vector<4x192xf32>
    %c191_i32_34 = arith.constant 191 : i32
    %99 = tpu.dynamic_rotate %82 by %c191_i32_34 dim 1 : vector<4x192xf32>, i32 -> vector<4x192xf32>
    %100 = vector.extract_strided_slice %2 {offsets = [5, 0], sizes = [1, 192], strides = [1, 1]} : vector<9x192xf32> to vector<1x192xf32>
    %101 = vector.broadcast %100 : vector<1x192xf32> to vector<4x192xf32>
    %102 = arith.mulf %99, %101 : vector<4x192xf32>
    %c185_i32_35 = arith.constant 185 : i32
    %103 = tpu.dynamic_rotate %82 by %c185_i32_35 dim 1 : vector<4x192xf32>, i32 -> vector<4x192xf32>
    %104 = vector.extract_strided_slice %2 {offsets = [6, 0], sizes = [1, 192], strides = [1, 1]} : vector<9x192xf32> to vector<1x192xf32>
    %105 = vector.broadcast %104 : vector<1x192xf32> to vector<4x192xf32>
    %106 = arith.mulf %103, %105 : vector<4x192xf32>
    %c184_i32_36 = arith.constant 184 : i32
    %107 = tpu.dynamic_rotate %82 by %c184_i32_36 dim 1 : vector<4x192xf32>, i32 -> vector<4x192xf32>
    %108 = vector.extract_strided_slice %2 {offsets = [7, 0], sizes = [1, 192], strides = [1, 1]} : vector<9x192xf32> to vector<1x192xf32>
    %109 = vector.broadcast %108 : vector<1x192xf32> to vector<4x192xf32>
    %110 = arith.mulf %107, %109 : vector<4x192xf32>
    %c183_i32_37 = arith.constant 183 : i32
    %111 = tpu.dynamic_rotate %82 by %c183_i32_37 dim 1 : vector<4x192xf32>, i32 -> vector<4x192xf32>
    %112 = vector.extract_strided_slice %2 {offsets = [8, 0], sizes = [1, 192], strides = [1, 1]} : vector<9x192xf32> to vector<1x192xf32>
    %113 = vector.broadcast %112 : vector<1x192xf32> to vector<4x192xf32>
    %114 = arith.mulf %111, %113 : vector<4x192xf32>
    %115 = tpu.concatenate %86, %90, %94, %98, %82, %102, %106, %110, %114 in 0 : vector<4x192xf32>, vector<4x192xf32>, vector<4x192xf32>, vector<4x192xf32>, vector<4x192xf32>, vector<4x192xf32>, vector<4x192xf32>, vector<4x192xf32>, vector<4x192xf32> -> vector<36x192xf32>
    %c0_38 = arith.constant 0 : index
    %c0_39 = arith.constant 0 : index
    %116 = vector.load %arg8[%c0_38, %c0_39] : memref<8x36xf32, #tpu.memory_space<vmem>>, vector<8x36xf32>
    %cst_40 = arith.constant dense<0.000000e+00> : vector<8x192xf32>
    %117 = tpu.matmul %116, %115, %cst_40 {dimension_numbers = #tpu.dot_dimension_numbers<[1], [0], [0], [1], [0, 0, 1, 1], [], []>} : vector<8x36xf32>, vector<36x192xf32>, vector<8x192xf32> -> vector<8x192xf32>
    %c0_41 = arith.constant 0 : index
    %c0_42 = arith.constant 0 : index
    %118 = vector.load %arg9[%c0_41, %c0_42] : memref<8x1xf32, #tpu.memory_space<vmem>>, vector<8x1xf32>
    %119 = vector.broadcast %118 : vector<8x1xf32> to vector<8x192xf32>
    %120 = arith.addf %117, %119 : vector<8x192xf32>
    %cst_43 = arith.constant 0.000000e+00 : f32
    %cst_44 = arith.constant 6.000000e+00 : f32
    %121 = vector.broadcast %cst_43 : f32 to vector<8x192xf32>
    %122 = arith.maximumf %121, %120 : vector<8x192xf32>
    %123 = vector.broadcast %cst_44 : f32 to vector<8x192xf32>
    %124 = arith.minimumf %123, %122 : vector<8x192xf32>
    %c9_i32_45 = arith.constant 9 : i32
    %125 = tpu.dynamic_rotate %124 by %c9_i32_45 dim 1 : vector<8x192xf32>, i32 -> vector<8x192xf32>
    %126 = vector.extract_strided_slice %2 {offsets = [0, 0], sizes = [1, 192], strides = [1, 1]} : vector<9x192xf32> to vector<1x192xf32>
    %127 = vector.broadcast %126 : vector<1x192xf32> to vector<8x192xf32>
    %128 = arith.mulf %125, %127 : vector<8x192xf32>
    %c8_i32_46 = arith.constant 8 : i32
    %129 = tpu.dynamic_rotate %124 by %c8_i32_46 dim 1 : vector<8x192xf32>, i32 -> vector<8x192xf32>
    %130 = vector.extract_strided_slice %2 {offsets = [1, 0], sizes = [1, 192], strides = [1, 1]} : vector<9x192xf32> to vector<1x192xf32>
    %131 = vector.broadcast %130 : vector<1x192xf32> to vector<8x192xf32>
    %132 = arith.mulf %129, %131 : vector<8x192xf32>
    %c7_i32_47 = arith.constant 7 : i32
    %133 = tpu.dynamic_rotate %124 by %c7_i32_47 dim 1 : vector<8x192xf32>, i32 -> vector<8x192xf32>
    %134 = vector.extract_strided_slice %2 {offsets = [2, 0], sizes = [1, 192], strides = [1, 1]} : vector<9x192xf32> to vector<1x192xf32>
    %135 = vector.broadcast %134 : vector<1x192xf32> to vector<8x192xf32>
    %136 = arith.mulf %133, %135 : vector<8x192xf32>
    %c1_i32_48 = arith.constant 1 : i32
    %137 = tpu.dynamic_rotate %124 by %c1_i32_48 dim 1 : vector<8x192xf32>, i32 -> vector<8x192xf32>
    %138 = vector.extract_strided_slice %2 {offsets = [3, 0], sizes = [1, 192], strides = [1, 1]} : vector<9x192xf32> to vector<1x192xf32>
    %139 = vector.broadcast %138 : vector<1x192xf32> to vector<8x192xf32>
    %140 = arith.mulf %137, %139 : vector<8x192xf32>
    %c191_i32_49 = arith.constant 191 : i32
    %141 = tpu.dynamic_rotate %124 by %c191_i32_49 dim 1 : vector<8x192xf32>, i32 -> vector<8x192xf32>
    %142 = vector.extract_strided_slice %2 {offsets = [5, 0], sizes = [1, 192], strides = [1, 1]} : vector<9x192xf32> to vector<1x192xf32>
    %143 = vector.broadcast %142 : vector<1x192xf32> to vector<8x192xf32>
    %144 = arith.mulf %141, %143 : vector<8x192xf32>
    %c185_i32_50 = arith.constant 185 : i32
    %145 = tpu.dynamic_rotate %124 by %c185_i32_50 dim 1 : vector<8x192xf32>, i32 -> vector<8x192xf32>
    %146 = vector.extract_strided_slice %2 {offsets = [6, 0], sizes = [1, 192], strides = [1, 1]} : vector<9x192xf32> to vector<1x192xf32>
    %147 = vector.broadcast %146 : vector<1x192xf32> to vector<8x192xf32>
    %148 = arith.mulf %145, %147 : vector<8x192xf32>
    %c184_i32_51 = arith.constant 184 : i32
    %149 = tpu.dynamic_rotate %124 by %c184_i32_51 dim 1 : vector<8x192xf32>, i32 -> vector<8x192xf32>
    %150 = vector.extract_strided_slice %2 {offsets = [7, 0], sizes = [1, 192], strides = [1, 1]} : vector<9x192xf32> to vector<1x192xf32>
    %151 = vector.broadcast %150 : vector<1x192xf32> to vector<8x192xf32>
    %152 = arith.mulf %149, %151 : vector<8x192xf32>
    %c183_i32_52 = arith.constant 183 : i32
    %153 = tpu.dynamic_rotate %124 by %c183_i32_52 dim 1 : vector<8x192xf32>, i32 -> vector<8x192xf32>
    %154 = vector.extract_strided_slice %2 {offsets = [8, 0], sizes = [1, 192], strides = [1, 1]} : vector<9x192xf32> to vector<1x192xf32>
    %155 = vector.broadcast %154 : vector<1x192xf32> to vector<8x192xf32>
    %156 = arith.mulf %153, %155 : vector<8x192xf32>
    %157 = tpu.concatenate %128, %132, %136, %140, %124, %144, %148, %152, %156 in 0 : vector<8x192xf32>, vector<8x192xf32>, vector<8x192xf32>, vector<8x192xf32>, vector<8x192xf32>, vector<8x192xf32>, vector<8x192xf32>, vector<8x192xf32>, vector<8x192xf32> -> vector<72x192xf32>
    %c0_53 = arith.constant 0 : index
    %c0_54 = arith.constant 0 : index
    %158 = vector.load %arg10[%c0_53, %c0_54] : memref<8x72xf32, #tpu.memory_space<vmem>>, vector<8x72xf32>
    %cst_55 = arith.constant dense<0.000000e+00> : vector<8x192xf32>
    %159 = tpu.matmul %158, %157, %cst_55 {dimension_numbers = #tpu.dot_dimension_numbers<[1], [0], [0], [1], [0, 0, 1, 1], [], []>} : vector<8x72xf32>, vector<72x192xf32>, vector<8x192xf32> -> vector<8x192xf32>
    %c0_56 = arith.constant 0 : index
    %c0_57 = arith.constant 0 : index
    %160 = vector.load %arg11[%c0_56, %c0_57] : memref<8x1xf32, #tpu.memory_space<vmem>>, vector<8x1xf32>
    %161 = vector.broadcast %160 : vector<8x1xf32> to vector<8x192xf32>
    %162 = arith.addf %159, %161 : vector<8x192xf32>
    %cst_58 = arith.constant 0.000000e+00 : f32
    %cst_59 = arith.constant 6.000000e+00 : f32
    %163 = vector.broadcast %cst_58 : f32 to vector<8x192xf32>
    %164 = arith.maximumf %163, %162 : vector<8x192xf32>
    %165 = vector.broadcast %cst_59 : f32 to vector<8x192xf32>
    %166 = arith.minimumf %165, %164 : vector<8x192xf32>
    %167 = vector.extract_strided_slice %7 {offsets = [40, 0], sizes = [8, 192], strides = [1, 1]} : vector<52x192xf32> to vector<8x192xf32>
    %168 = arith.addf %166, %167 : vector<8x192xf32>
    %cst_60 = arith.constant 0.000000e+00 : f32
    %cst_61 = arith.constant 6.000000e+00 : f32
    %169 = vector.broadcast %cst_60 : f32 to vector<8x192xf32>
    %170 = arith.maximumf %169, %168 : vector<8x192xf32>
    %171 = vector.broadcast %cst_61 : f32 to vector<8x192xf32>
    %172 = arith.minimumf %171, %170 : vector<8x192xf32>
    %c0_62 = arith.constant 0 : index
    %c24 = arith.constant 24 : index
    %c0_63 = arith.constant 0 : index
    %173 = vector.load %arg12[%c0_62, %c24, %c0_63] : memref<1x32x192xf32, #tpu.memory_space<vmem>>, vector<1x8x192xf32>
    %174 = vector.shape_cast %173 : vector<1x8x192xf32> to vector<8x192xf32>
    %175 = vector.shape_cast %172 : vector<8x192xf32> to vector<1x8x192xf32>
    tpu.vector_store %arg12[%c0_62, %c24, %c0_63], %175 {strides = array<i32>} : memref<1x32x192xf32, #tpu.memory_space<vmem>>, vector<1x8x192xf32>,
    return
  }
  func.func @transform_0(%arg0: i32, %arg1: i32) -> (i32, i32, i32) {
    %c0_i32 = arith.constant 0 : i32
    %c0_i32_0 = arith.constant 0 : i32
    return %arg0, %c0_i32, %arg1 : i32, i32, i32
  }
  func.func @transform_1(%arg0: i32, %arg1: i32) -> (i32, i32) {
    %c0_i32 = arith.constant 0 : i32
    %c0_i32_0 = arith.constant 0 : i32
    %c0_i32_1 = arith.constant 0 : i32
    return %c0_i32, %c0_i32_0 : i32, i32
  }
  func.func @transform_2(%arg0: i32, %arg1: i32) -> (i32, i32) {
    %c0_i32 = arith.constant 0 : i32
    %c0_i32_0 = arith.constant 0 : i32
    %c0_i32_1 = arith.constant 0 : i32
    return %c0_i32, %c0_i32_0 : i32, i32
  }
  func.func @transform_3(%arg0: i32, %arg1: i32) -> (i32, i32) {
    %c0_i32 = arith.constant 0 : i32
    %c0_i32_0 = arith.constant 0 : i32
    %c0_i32_1 = arith.constant 0 : i32
    return %c0_i32, %c0_i32_0 : i32, i32
  }
  func.func @transform_4(%arg0: i32, %arg1: i32) -> (i32, i32) {
    %c0_i32 = arith.constant 0 : i32
    %c0_i32_0 = arith.constant 0 : i32
    %c0_i32_1 = arith.constant 0 : i32
    return %c0_i32, %c0_i32_0 : i32, i32
  }
  func.func @transform_5(%arg0: i32, %arg1: i32) -> (i32, i32) {
    %c0_i32 = arith.constant 0 : i32
    %c0_i32_0 = arith.constant 0 : i32
    %c0_i32_1 = arith.constant 0 : i32
    return %c0_i32, %c0_i32_0 : i32, i32
  }
  func.func @transform_6(%arg0: i32, %arg1: i32) -> (i32, i32) {
    %c0_i32 = arith.constant 0 : i32
    %c0_i32_0 = arith.constant 0 : i32
    %c0_i32_1 = arith.constant 0 : i32
    return %c0_i32, %c0_i32_0 : i32, i32
  }
  func.func @transform_7(%arg0: i32, %arg1: i32) -> (i32, i32) {
    %c0_i32 = arith.constant 0 : i32
    %c0_i32_0 = arith.constant 0 : i32
    %c0_i32_1 = arith.constant 0 : i32
    return %c0_i32, %c0_i32_0 : i32, i32
  }
  func.func @transform_8(%arg0: i32, %arg1: i32) -> (i32, i32) {
    %c0_i32 = arith.constant 0 : i32
    %c0_i32_0 = arith.constant 0 : i32
    %c0_i32_1 = arith.constant 0 : i32
    return %c0_i32, %c0_i32_0 : i32, i32
  }
  func.func @transform_9(%arg0: i32, %arg1: i32) -> (i32, i32) {
    %c0_i32 = arith.constant 0 : i32
    %c0_i32_0 = arith.constant 0 : i32
    %c0_i32_1 = arith.constant 0 : i32
    return %c0_i32, %c0_i32_0 : i32, i32
  }
  func.func @transform_10(%arg0: i32, %arg1: i32) -> (i32, i32, i32) {
    %c0_i32 = arith.constant 0 : i32
    %c0_i32_0 = arith.constant 0 : i32
    return %arg0, %c0_i32, %arg1 : i32, i32, i32
  }
}

</mosaic_0001>

<bundles_post_ra>
// kernel: tpu_custom_call.1
= control target key start
LH: loop header
LB: loop body
LE: loop exit
PB: predicated region body
PF: predicated region fallthrough
CT: control target
= control target key end

     0   :  { %15 = vsyncpa [#allocation3], 0  ;;  %s2478_s0 = inlined_call_operand.vmem [shape: f32[2,4,192], index: 0, kind: input, shape index: {}]   ;;  %s2479_s1 = inlined_call_operand.vmem [shape: f32[9,192], index: 1, kind: input, shape index: {}]   ;;  %s2480_s2 = inlined_call_operand.vmem [shape: f32[52,4], index: 2, kind: input, shape index: {}]   ;;  %s2481_s3 = inlined_call_operand.vmem [shape: f32[52,1], index: 3, kind: input, shape index: {}]   ;;  %s2482_s4 = inlined_call_operand.vmem [shape: f32[16,72], index: 4, kind: input, shape index: {}]   ;;  %s2483_s5 = inlined_call_operand.vmem [shape: f32[16,1], index: 5, kind: input, shape index: {}]   ;;  %s2484_s6 = inlined_call_operand.vmem [shape: f32[8,36], index: 6, kind: input, shape index: {}]   ;;  %s2485_s7 = inlined_call_operand.vmem [shape: f32[8,1], index: 7, kind: input, shape index: {}]   ;;  %s2486_s8 = inlined_call_operand.vmem [shape: f32[8,72], index: 8, kind: input, shape index: {}]   ;;  %s2487_s9 = inlined_call_operand.vmem [shape: f32[8,1], index: 9, kind: input, shape index: {}]   ;;  %s2488_s10 = inlined_call_operand.hbm [shape: f32[2,32,192], index: 10, kind: output, shape index: {}]  }
   0x1   :  { %17 = vsyncpa [#allocation3 + $0x1], 0  ;;  %s1921_s13 = smov 0   ;;  %s1923_s14 = smov 0  }
   0x2   :  { %s1925_s15 = smov 0   ;;  %s1927_s16 = smov 0  }
   0x3   :  { %s1929_s17 = smov 0   ;;  %s1931_s18 = smov 0  }
   0x4 LB: > { %s1420_s19 = sadd.s32 4294967295, %s1844_s18   ;;  %s1421_s20 = sadd.s32 4294967294, %s1844_s18   ;;  %s1844_s18 = sphi %s1931_s18, %s23_s18   ;;  %s1840_s17 = sphi %s1929_s17, %s2505_s17   ;;  %s1836_s16 = sphi %s1927_s16, %s2504_s16   ;;  %s1832_s15 = sphi %s1925_s15, %s2503_s15   ;;  %s1828_s14 = sphi %s1923_s14, %s2502_s14   ;;  %s1824_s13 = sphi %s1921_s13, %s2501_s13  }
   0x5   : > { %s35_s21 = sadd.s32 1, %s1840_s17  ;;  %s261_s22 = sadd.s32 1, %s1832_s15 }
   0x6   : > { %p37_p0 = scmp.ge.s32.totalorder %s35_s21, 2  ;;  %p271_p1 = scmp.ne.s32.totalorder %s1832_s15, %s1828_s14 }
   0x7   : > { %p272_p2 = scmp.eq.s32.totalorder %s1420_s19, 1  ;;  %p277_p3 = scmp.ne.s32.totalorder %s1828_s14, %s1824_s13 }
   0x8   : > { %s2507_s21 = smov (%p37_p0, %s35_s21), 0  ;;  %p278_p5 = scmp.eq.s32.totalorder %s1421_s20, 1 }
   0x9   : > { %2494 = sst [smem:[#allocation5_spill]] %s2507_s21  ;;  %p1961_p4 = por %p272_p2, %p271_p1 }
   0xa   : > { %s256_s24 = ssub.s32 %s1840_s17, %s2507_s21  ;;  %p1424_p6 = scmp.ge.s32.totalorder %s1844_s18, 1 }
   0xb   : > { %p259_p7 = scmp.eq.s32.totalorder %s256_s24, 0  ;;  %p1968_p8 = por %p278_p5, %p277_p3 }
   0xc   : > { %p336_p9 = scmp.lt.s32.totalorder %s1844_s18, 3 }
   0xd   : > { %s1974_s26 = scalar_select %p259_p7, %s1832_s15, %s261_s22  }
   0xe   : > { %p337_p10 = pnand %p1424_p6, %p336_p9 }
   0xf   : > { %p379_p11 = scmp.lt.s32.totalorder (!%p337_p10), %s1836_s16, 1  ;;  %s1847_s21 = smov (!%p337_p10), 9  }
  0x10   : > { %340 = sbr.rel (%p337_p10) target bundleno = 1434 (0x59a), region = 60  ;;  %s1848_s11 = smov (!%p337_p10), 8  }
  0x11   : > { %s1849_s28 = smov (!%p337_p10), 7   ;;  %s1852_s12 = smov (!%p337_p10), 63  }
  0x12   : > { %s1856_s20 = smov (!%p337_p10), 48   ;;  %s1857_s22 = smov (!%p337_p10), 47  }
  0x13   : > { %s1858_s24 = smov (!%p337_p10), 55   ;;  %s1859_s27 = smov (!%p337_p10), 54  }
  0x15   : > { %v1846_v0 = vmov 0   ;;  %v402_v1 = vld [vmem:[%s2481_s3 + $0x8] sm:$0xff]  ;;  %s380_s29 = scalar_select %p379_p11, %s1836_s16, 1  ;;  %v407_v3 = vld [vmem:[%s2481_s3 + $0x30] sm:$0xf]  ;;  %v1990_v4 = vld [vmem:[%s2479_s1] sm:$0xff] }
  0x16   : > { %1536 = vset.pattern.permute.xlu0 %v1846_v0  ;;  %1763 = vset.pattern.permute.xlu1 %v1846_v0  ;;  %vm469_vm0 = vcmask 1043456   ;;  %v394_v5 = vld [vmem:[%s2480_s2] sm:$0xff]  ;;  %vm447_vm1 = vcmask 31744   ;;  %v658_v6 = vperm.slane %v1990_v4, 7  ;;  %v1764_v9 = vld [vmem:[%s2479_s1 + $0x10] ss:$0 sm:$0xff] }
  0x17   : > { %415 = vperm.xlu0 %1536, %v402_v1   ;;  %1762 = vset.pattern.permute.xlu2 %v1846_v0  ;;  %s1459_s30 = sshll.u32 %s380_s29, 3  ;;  %v395_v10 = vld [vmem:[%s2480_s2 + $0x8] sm:$0xff]  ;;  %v1765_v11 = vld [vmem:[%s2479_s1 + $0x18] ss:$0 sm:$0xff]  ;;  %v396_v12 = vld [vmem:[%s2480_s2 + $0x10] sm:$0xff]  ;;  %v644_v13 = vperm.slane %v1990_v4, 6 }
  0x18   : > { %s386_s19 = scalar_lea.vmem %s2478_s0, %s1459_s30  ;;  %676 = vrot.lane.b32.xlu2 %v1764_v9, %s1847_s21  ;;  %v397_v14 = vld [vmem:[%s2480_s2 + $0x18] sm:$0xff]  ;;  %v398_v15 = vld [vmem:[%s2480_s2 + $0x20] sm:$0xff]  ;;  %v399_v16 = vld [vmem:[%s2480_s2 + $0x28] sm:$0xff]  ;;  %v602_v20 = vperm.slane %v1990_v4, 2  ;;  %s1850_s30 = smov 57   ;;  %v588_v24 = vperm.slane %v1990_v4, 1 }
  0x19   : > { %v389_v2 = vld [vmem:[%s386_s19] sm:$0xff]  ;;  %v400_v17 = vld [vmem:[%s2480_s2 + $0x30] sm:$0xf]  ;;  %v2041_v18 = vld [vmem:[%s2479_s1 + $0x8] sm:$0xff]  ;;  %s1853_s19 = smov 56   ;;  %v630_v40 = vperm.slane %v1990_v4, 5 }
  0x1a   : > { %444 = vst [vmem:[#allocation1] ss:$2 sm:$0xff] %v389_v2  ;;  %v645_v19 = vperm.slane %v2041_v18, 6  ;;  %v631_v21 = vperm.slane %v2041_v18, 5  ;;  %v617_v22 = vperm.slane %v2041_v18, 3  ;;  %v659_v39 = vperm.slane %v2041_v18, 7 }
  0x1b   : > { %v616_v41 = vperm.slane %v1990_v4, 3  ;;  %v603_v43 = vperm.slane %v2041_v18, 2  ;;  %vm680_vm2 = vcmask 72704   ;;  %vm567_vm3 = vcmask 1048064   ;;  %s2490_s29 = smov 126  }
  0x1c   : > { %v589_v58 = vperm.slane %v2041_v18, 1  ;;  %vm652_vm4 = vcmask 56320   ;;  %vm666_vm5 = vcmask 64512   ;;  %vm638_vm6 = vcmask 7168  }
  0x1d   : > { %vm624_vm7 = vcmask 515072   ;;  %vm610_vm8 = vcmask 465920   ;;  %vm596_vm9 = vcmask 457728   ;;  %vm747_vm10 = vcmask 375808  }
  0x1e   : > { %vm731_vm11 = vcmask 392192   ;;  %vm739_vm12 = vcmask 384000   ;;  %vm723_vm13 = vcmask 441344   ;;  %vm582_vm14 = vcmask 449536  }
  0x1f   : > { %440 = vperm.xlu0 %1536, %v407_v3   ;;  %vm700_vm15 = vcmask 1031168  }
  0x20   : > { %678 = vrot.lane.b32.xlu2 %v1765_v11, %s1847_s21  ;;  %s1851_s21 = smov 1  }
  0x21   : > { %v445_v7 = vld.sshfl [vmem:[#allocation1] sm:$0xff pattern:$0x75316420]  ;;  %v446_v8 = vld.sshfl [vmem:[#allocation1 + $0x8] sm:$0xff pattern:$0x75316420] }
  0x22   : > { %1428 = vmatpush.msk.msra.mxu0 %vm469_vm0, %v445_v7  ;;  %1436 = vmatpush.msk.msra.mxu1 %vm469_vm0, %v446_v8 }
  0x23   : > { %1429 = vmatmul.msk.f32.vlgmr.msra.gmra.mxu0 %vm447_vm1, %v394_v5  ;;  %1437 = vmatmul.msk.f32.vlgmr.msra.gmra.mxu1 %vm447_vm1, %v394_v5 }
  0x27   : > { %662 = vrot.lane.b32.xlu0 %v658_v6, %s1848_s11 }
  0x28   : > { %648 = vrot.lane.b32.xlu2 %v644_v13, %s1849_s28 }
  0x2b   : > { %1430 = vmatmul.msk.f32.gmra.mxu0 %vm447_vm1, %v395_v10  ;;  %1438 = vmatmul.msk.f32.gmra.mxu1 %vm447_vm1, %v395_v10 }
  0x2f   : > { %650 = vrot.lane.b32.xlu0 %v645_v19, %s1849_s28  ;;  %s1854_s28 = smov 64  }
  0x30   : > { %636 = vrot.lane.b32.xlu2 %v631_v21, %s1851_s21 }
  0x33   : > { %1431 = vmatmul.msk.f32.gmra.mxu0 %vm447_vm1, %v396_v12  ;;  %1439 = vmatmul.msk.f32.gmra.mxu1 %vm447_vm1, %v396_v12 }
  0x37   : > { %606 = vrot.lane.b32.xlu0 %v602_v20, %s1850_s30 }
  0x38   : > { %622 = vrot.lane.b32.xlu2 %v617_v22, %s1852_s12 }
  0x3b   : > { %1432 = vmatmul.msk.f32.gmra.mxu0 %vm447_vm1, %v397_v14  ;;  %1440 = vmatmul.msk.f32.gmra.mxu1 %vm447_vm1, %v397_v14 }
  0x40   : > { %592 = vrot.lane.b32.xlu2 %v588_v24, %s1853_s19 }
  0x43   : > { %1433 = vmatmul.msk.f32.gmra.mxu0 %vm447_vm1, %v398_v15  ;;  %1441 = vmatmul.msk.f32.gmra.mxu1 %vm447_vm1, %v398_v15 }
  0x4b   : > { %1434 = vmatmul.msk.f32.gmra.mxu0 %vm447_vm1, %v399_v16  ;;  %1442 = vmatmul.msk.f32.gmra.mxu1 %vm447_vm1, %v399_v16  ;;  %v575_v16 = vperm.slane %v2041_v18, 0  ;;  %v574_v18 = vperm.slane %v1990_v4, 0 }
  0x53   : > { %1435 = vmatmul.msk.f32.gmra.mxu0 %vm447_vm1, %v400_v17  ;;  %1443 = vmatmul.msk.f32.gmra.mxu1 %vm447_vm1, %v400_v17  ;;  %vm692_vm1 = vcmask 1039360  }
  0x72   : > { %v2076_v45 = vpop.permute.xlu2 %676 }
  0x7a   : > { %v679_v49 = vpop.permute.xlu2 %678 }
  0x7b   : > { %v2083_v51 = vsel %vm680_vm2, %v2076_v45, %v679_v49  ;;  %vm708_vm2 = vcmask 982016  }
  0x82   : > { %v2106_v1 = vpop.permute.xlu2 %648 }
  0x89   : > { %v416_v25 = vpop.permute.xlu0 %415 }
  0x8a   : > { %v637_v17 = vpop.permute.xlu2 %636 }
  0x91   : > { %v441_v34 = vpop.permute.xlu0 %440 }
  0x99   : > { %v2104_v63 = vpop.permute.xlu0 %662 }
  0xa0   : > { %v2048_v23 = vpop.f32.mrf.mxu0  ;;  %v2072_v42 = vpop.f32.mrf.mxu1 }
  0xa1   : > { %v651_v3 = vpop.permute.xlu0 %650 }
  0xa2   : > { %v2113_v6 = vsel %vm652_vm4, %v2106_v1, %v651_v3  ;;  %vm801_vm4 = vcmask 596992  }
  0xa8   : > { %v494_v26 = vpop.f32.mrf.mxu0  ;;  %v532_v44 = vpop.f32.mrf.mxu1 }
  0xa9   : > { %v495_v27 = vadd.f32 %v494_v26, %v416_v25  ;;  %v533_v47 = vadd.f32 %v532_v44, %v416_v25  ;;  %v2161_v4 = vpop.permute.xlu0 %606 }
  0xab   : > { %v563_v28 = vmax.f32 %v495_v27, 0.0  ;;  %v564_v48 = vmax.f32 %v533_v47, 0.0 }
  0xad   : > { %v2052_v29 = vmin.f32 %v563_v28, 6.0  ;;  %v566_v52 = vmin.f32 %v564_v48, 6.0 }
  0xaf   : > { %568 = vrot.lane.b32.xlu1 %v2052_v29, %s1854_s28  ;;  %v684_v55 = vmul.f32 %v2076_v45, %v2052_v29  ;;  %v656_v9 = vmul.f32 %v2106_v1, %v2052_v29  ;;  %v670_v13 = vmul.f32 %v2104_v63, %v2052_v29  ;;  %v1557_v24 = vpack.i.bf16 %v566_v52, %v2052_v29 }
  0xb0   : > { %v2056_v30 = vpop.f32.mrf.mxu0  ;;  %v2078_v46 = vpop.f32.mrf.mxu1 }
  0xb8   : > { %v2058_v31 = vpop.f32.mrf.mxu0  ;;  %v2080_v50 = vpop.f32.mrf.mxu1 }
  0xc0   : > { %v2060_v32 = vpop.f32.mrf.mxu0  ;;  %v2099_v59 = vpop.f32.mrf.mxu1 }
  0xc8   : > { %v2062_v33 = vpop.f32.mrf.mxu0  ;;  %v2102_v60 = vpop.f32.mrf.mxu1 }
  0xd0   : > { %v509_v35 = vpop.f32.mrf.mxu0  ;;  %v547_v61 = vpop.f32.mrf.mxu1 }
  0xd1   : > { %v510_v36 = vadd.f32 %v509_v35, %v441_v34  ;;  %v548_v62 = vadd.f32 %v547_v61, %v441_v34 }
  0xd3   : > { %v906_v37 = vmax.f32 %v510_v36, 0.0  ;;  %v907_v0 = vmax.f32 %v548_v62, 0.0 }
  0xd5   : > { %v2064_v38 = vmin.f32 %v906_v37, 6.0  ;;  %v2108_v2 = vmin.f32 %v907_v0, 6.0 }
  0xd7   : > { %910 = vrot.lane.b32.xlu1 %v2064_v38, %s1854_s28  ;;  %v930_v27 = vmul.f32 %v2064_v38, %v2076_v45  ;;  %v928_v28 = vmul.f32 %v2064_v38, %v2104_v63 }
  0xd9   : > { %v994_v34 = vrot.slane %v928_v28, 4 }
  0xdf   : > { %664 = vrot.lane.b32.xlu1 %v659_v39, %s1848_s11  ;;  %s1855_s11 = smov 46   ;;  %v623_v39 = vpop.permute.xlu2 %622 }
  0xe7   : > { %634 = vrot.lane.b32.xlu1 %v630_v40, %s1851_s21  ;;  %s1862_s21 = smov 127  }
  0xef   : > { %620 = vrot.lane.b32.xlu1 %v616_v41, %s1852_s12  ;;  %s2491_s12 = smov 73  }
  0xf7   : > { %608 = vrot.lane.b32.xlu1 %v603_v43, %s1850_s30  ;;  %s2493_s30 = smov 120  }
 0x121   : > { %v2085_v53 = vpop.permute.xlu1 %568 }
 0x122   : > { %v2089_v54 = vsel %vm567_vm3, %v2085_v53, %v566_v52 }
 0x123   : > { %571 = vrot.lane.b32.xlu0 %v2089_v54, %s1854_s28  ;;  %v685_v56 = vmul.f32 %v2083_v51, %v2089_v54  ;;  %v657_v8 = vmul.f32 %v2113_v6, %v2089_v54  ;;  %v614_v47 = vmul.f32 %v2161_v4, %v2089_v54 }
 0x125   : > { %v1537_v57 = vpack.i.bf16 %v685_v56, %v684_v55  ;;  %v1547_v11 = vpack.i.bf16 %v657_v8, %v656_v9  ;;  %v926_v9 = vmul.f32 %v2064_v38, %v2106_v1 }
 0x127   : > { %1538 = vrot.lane.b32.xlu2 %v1537_v57, %s1855_s11 }
 0x12b   : > { %594 = vrot.lane.b32.xlu0 %v589_v58, %s1853_s19  ;;  %s375_s19 = sand.u32 1, %s1828_s14  }
 0x149   : > { %v2110_v5 = vpop.permute.xlu1 %910 }
 0x14a   : > { %v2118_v7 = vsel %vm567_vm3, %v2110_v5, %v2108_v2 }
 0x14b   : > { %913 = vrot.lane.b32.xlu1 %v2118_v7, %s1854_s28  ;;  %v931_v3 = vmul.f32 %v2118_v7, %v2083_v51  ;;  %v927_v8 = vmul.f32 %v2118_v7, %v2113_v6 }
 0x151   : > { %v665_v10 = vpop.permute.xlu1 %664 }
 0x152   : > { %v2127_v12 = vsel %vm666_vm5, %v2104_v63, %v665_v10  ;;  %v1587_v10 = vpack.i.bf16 %v2108_v2, %v2064_v38  ;;  %vm829_vm5 = vcmask 588800  }
 0x153   : > { %v671_v14 = vmul.f32 %v2127_v12, %v2089_v54  ;;  %1548 = vrot.lane.b32.xlu1 %v1547_v11, %s1856_s20  ;;  %v929_v26 = vmul.f32 %v2118_v7, %v2127_v12 }
 0x155   : > { %v1542_v15 = vpack.i.bf16 %v671_v14, %v670_v13  ;;  %v1577_v13 = vpack.i.bf16 %v927_v8, %v926_v9 }
 0x157   : > { %1543 = vrot.lane.b32.xlu0 %v1542_v15, %s1857_s22 }
 0x159   : > { %v2136_v19 = vpop.permute.xlu1 %634 }
 0x15a   : > { %v2139_v20 = vsel %vm638_vm6, %v2136_v19, %v637_v17  ;;  %v642_v21 = vmul.f32 %v2136_v19, %v2052_v29  ;;  %v995_v29 = vrot.slane %v929_v26, 4  ;;  %v924_v11 = vmul.f32 %v2064_v38, %v2136_v19 }
 0x15b   : > { %v643_v22 = vmul.f32 %v2139_v20, %v2089_v54  ;;  %580 = vrot.lane.b32.xlu1 %v575_v16, %s1858_s24  ;;  %v925_v14 = vmul.f32 %v2118_v7, %v2139_v20 }
 0x15c   : > { %v1582_v35 = vpack.i.bf16 %v995_v29, %v994_v34  ;;  %v974_v15 = vrot.slane %v924_v11, 4 }
 0x15d   : > { %v1552_v25 = vpack.i.bf16 %v643_v22, %v642_v21  ;;  %v975_v16 = vrot.slane %v925_v14, 4 }
 0x15f   : > { %1553 = vrot.lane.b32.xlu2 %v1552_v25, %s1859_s27  ;;  %1558 = vrot.lane.b32.xlu0 %v1557_v24, %s1858_s24  ;;  %v1592_v17 = vpack.i.bf16 %v975_v16, %v974_v15 }
 0x161   : > { %v2159_v36 = vpop.permute.xlu1 %620 }
 0x162   : > { %v2164_v40 = vsel %vm624_vm7, %v2159_v36, %v623_v39  ;;  %v628_v48 = vmul.f32 %v2159_v36, %v2089_v54  ;;  %v922_v2 = vmul.f32 %v2118_v7, %v2159_v36 }
 0x167   : > { %578 = vrot.lane.b32.xlu0 %v574_v18, %s1858_s24 }
 0x169   : > { %v609_v37 = vpop.permute.xlu1 %608 }
 0x16a   : > { %v2167_v41 = vsel %vm610_vm8, %v2161_v4, %v609_v37 }
 0x16f   : > { %1005 = vrot.lane.b32.xlu0 %v930_v27, %s1855_s11  ;;  %v920_v27 = vmul.f32 %v2118_v7, %v2161_v4 }
 0x177   : > { %1583 = vrot.lane.b32.xlu0 %v1582_v35, %s1857_s22  ;;  %v954_v35 = vrot.slane %v922_v2, 4 }
 0x195   : > { %v572_v43 = vpop.permute.xlu0 %571 }
 0x196   : > { %v2171_v44 = vsel %vm567_vm3, %v572_v43, %v2085_v53  ;;  %v2183_v53 = vpop.permute.xlu2 %592 }
 0x197   : > { %v629_v49 = vmul.f32 %v2164_v40, %v2171_v44  ;;  %v615_v52 = vmul.f32 %v2167_v41, %v2171_v44  ;;  %v600_v61 = vmul.f32 %v2183_v53, %v2089_v54  ;;  %v918_v21 = vmul.f32 %v2118_v7, %v2183_v53 }
 0x199   : > { %v1567_v55 = vpack.i.bf16 %v615_v52, %v614_v47  ;;  %v1562_v56 = vpack.i.bf16 %v629_v49, %v628_v48  ;;  %v934_v28 = vrot.slane %v918_v21, 4 }
 0x19b   : > { %1568 = vrot.lane.b32.xlu2 %v1567_v55, %s2490_s29  ;;  %1563 = vrot.lane.b32.xlu1 %v1562_v56, %s2493_s30 }
 0x19d   : > { %v595_v57 = vpop.permute.xlu0 %594 }
 0x19e   : > { %v2186_v58 = vsel %vm596_vm9, %v2183_v53, %v595_v57  ;;  %v1539_v24 = vpop.permute.xlu2 %1538 }
 0x19f   : > { %v601_v62 = vmul.f32 %v2186_v58, %v2171_v44  ;;  %v1540_v39 = vunpack.i.l.bf16 %v1539_v24 }
 0x1a1   : > { %v1572_v0 = vpack.i.bf16 %v601_v62, %v600_v61 }
 0x1a3   : > { %1573 = vrot.lane.b32.xlu2 %v1572_v0, %s1862_s21  ;;  %1007 = vrot.lane.b32.xlu1 %v931_v3, %s1855_s11 }
 0x1ab   : > { %1578 = vrot.lane.b32.xlu2 %v1577_v13, %s1856_s20  ;;  %1588 = vrot.lane.b32.xlu1 %v1587_v10, %s1858_s24 }
 0x1b3   : > { %1593 = vrot.lane.b32.xlu2 %v1592_v17, %s1859_s27 }
 0x1b9   : > { %v1554_v56 = vpop.permute.xlu2 %1553 }
 0x1ba   : > { %v1556_v0 = vunpack.i.h.bf16 %v1554_v56  ;;  %v1555_v3 = vunpack.i.l.bf16 %v1554_v56 }
 0x1bc   : > { %v724_v14 = vsel %vm723_vm13, %v1555_v3, %v1556_v0 }
 0x1bd   : > { %v914_v38 = vpop.permute.xlu1 %913  ;;  %v1627_v15 = vpack.i.bf16 %v724_v14, %v1555_v3 }
 0x1be   : > { %v2215_v22 = vsel %vm567_vm3, %v914_v38, %v2110_v5  ;;  %v1541_v5 = vunpack.i.h.bf16 %v1539_v24 }
 0x1bf   : > { %v919_v25 = vmul.f32 %v2215_v22, %v2186_v58  ;;  %v921_v18 = vmul.f32 %v2215_v22, %v2167_v41  ;;  %v923_v26 = vmul.f32 %v2215_v22, %v2164_v40 }
 0x1c0   : > { %v748_v49 = vsel %vm747_vm10, %v1540_v39, %v1541_v5 }
 0x1c1   : > { %v1597_v29 = vpack.i.bf16 %v921_v18, %v920_v27  ;;  %v935_v34 = vrot.slane %v919_v25, 4  ;;  %v955_v37 = vrot.slane %v923_v26, 4  ;;  %v1612_v61 = vpack.i.bf16 %v748_v49, %v1540_v39 }
 0x1c3   : > { %1598 = vrot.lane.b32.xlu0 %v1597_v29, %s2490_s29  ;;  %v1607_v43 = vpack.i.bf16 %v935_v34, %v934_v28  ;;  %v1602_v47 = vpack.i.bf16 %v955_v37, %v954_v35  ;;  %s1324_s29 = scalar_lea.sflag [#allocation3], %s375_s19 }
 0x1c5   : > { %1608 = vrot.lane.b32.xlu2 %v1607_v43, %s1862_s21  ;;  %1603 = vrot.lane.b32.xlu1 %v1602_v47, %s2493_s30  ;;  %v1549_v48 = vpop.permute.xlu1 %1548 }
 0x1c6   : > { %v1551_v52 = vunpack.i.h.bf16 %v1549_v48  ;;  %v1550_v55 = vunpack.i.l.bf16 %v1549_v48 }
 0x1c8   : > { %v732_v57 = vsel %vm731_vm11, %v1550_v55, %v1551_v52 }
 0x1c9   : > { %v1544_v62 = vpop.permute.xlu0 %1543  ;;  %v1622_v10 = vpack.i.bf16 %v732_v57, %v1550_v55 }
 0x1ca   : > { %v1546_v8 = vunpack.i.h.bf16 %v1544_v62  ;;  %v1545_v9 = vunpack.i.l.bf16 %v1544_v62 }
 0x1cb   : > { %1613 = vrot.lane.b32.xlu0 %v1612_v61, %s2491_s12 }
 0x1cc   : > { %v740_v11 = vsel %vm739_vm12, %v1545_v9, %v1546_v8 }
 0x1cd   : > { %v1617_v13 = vpack.i.bf16 %v740_v11, %v1545_v9  ;;  %1623 = vrot.lane.b32.xlu2 %v1622_v10, %s2491_s12  ;;  %v581_v43 = vpop.permute.xlu1 %580 }
 0x1cf   : > { %1618 = vrot.lane.b32.xlu1 %v1617_v13, %s2491_s12 }
 0x1d1   : > { %v1559_v16 = vpop.permute.xlu0 %1558 }
 0x1d2   : > { %v1561_v17 = vunpack.i.h.bf16 %v1559_v16  ;;  %v1560_v21 = vunpack.i.l.bf16 %v1559_v16 }
 0x1d3   : > { %1628 = vrot.lane.b32.xlu0 %v1627_v15, %s2491_s12 }
 0x1d4   : > { %v716_v2 = vsel %vm582_vm14, %v1560_v21, %v1561_v17 }
 0x1d5   : > { %v1632_v38 = vpack.i.bf16 %v716_v2, %v1560_v21 }
 0x1d7   : > { %1633 = vrot.lane.b32.xlu1 %v1632_v38, %s2491_s12 }
 0x1d9   : > { %v2238_v26 = vpop.permute.xlu0 %578 }
 0x1da   : > { %v2248_v57 = vsel %vm582_vm14, %v2238_v26, %v581_v43  ;;  %v586_v61 = vmul.f32 %v2238_v26, %v2089_v54 }
 0x1db   : > { %v587_v62 = vmul.f32 %v2248_v57, %v2171_v44 }
 0x1dd   : > { %v1642_v15 = vpack.i.bf16 %v587_v62, %v586_v61 }
 0x1e1   : > { %v1006_v39 = vpop.permute.xlu0 %1005 }
 0x1e9   : > { %v1584_v3 = vpop.permute.xlu0 %1583 }
 0x1ea   : > { %v1586_v13 = vunpack.i.h.bf16 %v1584_v3  ;;  %v1585_v14 = vunpack.i.l.bf16 %v1584_v3 }
 0x1ec   : > { %v1000_v54 = vsel %vm739_vm12, %v1585_v14, %v1586_v13 }
 0x1f5   : > { %v1569_v24 = vpop.permute.xlu2 %1568 }
 0x1f6   : > { %v1571_v25 = vunpack.i.h.bf16 %v1569_v24  ;;  %v1570_v18 = vunpack.i.l.bf16 %v1569_v24 }
 0x1f8   : > { %v701_v27 = vsel %vm700_vm15, %v1570_v18, %v1571_v25 }
 0x1f9   : > { %v1647_v28 = vpack.i.bf16 %v1571_v25, %v701_v27 }
 0x1fb   : > { %1648 = vrot.lane.b32.xlu0 %v1647_v28, %s2491_s12 }
 0x1fd   : > { %v1574_v29 = vpop.permute.xlu2 %1573 }
 0x1fe   : > { %v1576_v34 = vunpack.i.h.bf16 %v1574_v29  ;;  %v1575_v35 = vunpack.i.l.bf16 %v1574_v29 }
 0x200   : > { %v693_v37 = vsel %vm692_vm1, %v1575_v35, %v1576_v34 }
 0x201   : > { %v1652_v5 = vpack.i.bf16 %v1576_v34, %v693_v37 }
 0x203   : > { %1049 = vrot.lane.b32.xlu0 %v1006_v39, %s2491_s12  ;;  %1653 = vrot.lane.b32.xlu1 %v1652_v5, %s2491_s12 }
 0x205   : > { %v1579_v47 = vpop.permute.xlu2 %1578 }
 0x206   : > { %v1581_v9 = vunpack.i.h.bf16 %v1579_v47  ;;  %v1580_v10 = vunpack.i.l.bf16 %v1579_v47  ;;  %v916_v47 = vmul.f32 %v2118_v7, %v2238_v26 }
 0x208   : > { %v989_v16 = vsel %vm731_vm11, %v1580_v10, %v1581_v9  ;;  %v1016_v24 = vsel %vm469_vm0, %v1580_v10, %v1585_v14 }
 0x209   : > { %v1017_v25 = vsel %vm469_vm0, %v989_v16, %v1000_v54 }
 0x20a   : > { %v1657_v37 = vpack.i.bf16 %v1017_v25, %v1016_v24 }
 0x20d   : > { %v1564_v48 = vpop.permute.xlu1 %1563  ;;  %v1594_v11 = vpop.permute.xlu2 %1593 }
 0x20e   : > { %v1566_v49 = vunpack.i.h.bf16 %v1564_v48  ;;  %v1565_v52 = vunpack.i.l.bf16 %v1564_v48  ;;  %v1596_v17 = vunpack.i.h.bf16 %v1594_v11  ;;  %v1595_v21 = vunpack.i.l.bf16 %v1594_v11 }
 0x20f   : > { %v917_v48 = vmul.f32 %v2215_v22, %v2248_v57 }
 0x210   : > { %v709_v55 = vsel %vm708_vm2, %v1565_v52, %v1566_v49  ;;  %v980_v18 = vsel %vm723_vm13, %v1595_v21, %v1596_v17 }
 0x211   : > { %v1637_v56 = vpack.i.bf16 %v1566_v49, %v709_v55 }
 0x213   : > { %1638 = vrot.lane.b32.xlu2 %v1637_v56, %s2491_s12  ;;  %v1019_v56 = vld [vmem:[%s2485_s7] sm:$0xff] }
 0x215   : > { %v1008_v0 = vpop.permute.xlu1 %1007 }
 0x216   : > { %v1009_v8 = vsel %vm747_vm10, %v1006_v39, %v1008_v0 }
 0x217   : > { %1051 = vrot.lane.b32.xlu1 %v1009_v8, %s2491_s12 }
 0x21b   : > { %1643 = vrot.lane.b32.xlu2 %v1642_v15, %s2491_s12 }
 0x21d   : > { %v1589_v44 = vpop.permute.xlu1 %1588 }
 0x21e   : > { %v1591_v2 = vunpack.i.h.bf16 %v1589_v44  ;;  %v1590_v38 = vunpack.i.l.bf16 %v1589_v44 }
 0x21f   : > { %v1609_v27 = vpop.permute.xlu2 %1608 }
 0x220   : > { %v969_v28 = vsel %vm582_vm14, %v1590_v38, %v1591_v2  ;;  %v1611_v29 = vunpack.i.h.bf16 %v1609_v27  ;;  %v1610_v34 = vunpack.i.l.bf16 %v1609_v27  ;;  %v1014_v35 = vsel %vm469_vm0, %v1590_v38, %v1595_v21 }
 0x221   : > { %v1015_v5 = vsel %vm469_vm0, %v969_v28, %v980_v18 }
 0x222   : > { %v1662_v39 = vpack.i.bf16 %v1015_v5, %v1014_v35  ;;  %v940_v43 = vsel %vm692_vm1, %v1610_v34, %v1611_v29  ;;  %v1011_v52 = vsel %vm469_vm0, %v917_v48, %v1611_v29 }
 0x223   : > { %1658 = vrot.lane.b32.xlu2 %v1657_v37, %s2491_s12  ;;  %v1010_v49 = vsel %vm469_vm0, %v916_v47, %v940_v43 }
 0x224   : > { %1663 = vrot.lane.b32.xlu0 %v1662_v39, %s2491_s12  ;;  %v1672_v55 = vpack.i.bf16 %v1011_v52, %v1010_v49 }
 0x227   : > { %v1624_v17 = vpop.permute.xlu2 %1623 }
 0x228   : > { %v1625_v44 = vunpack.i.l.bf16 %v1624_v17  ;;  %v1626_v24 = vunpack.i.h.bf16 %v1624_v17 }
 0x22a   : > { %v808_v28 = vsel %vm801_vm4, %v1625_v44, %v1626_v24 }
 0x22b   : > { %1673 = vrot.lane.b32.xlu2 %v1672_v55, %s2491_s12 }
 0x22c   : > { %1022 = vperm.xlu0 %1536, %v1019_v56  }
 0x235   : > { %v1599_v61 = vpop.permute.xlu0 %1598 }
 0x236   : > { %v1601_v62 = vunpack.i.h.bf16 %v1599_v61  ;;  %v1600_v7 = vunpack.i.l.bf16 %v1599_v61 }
 0x237   : > { %v1604_v0 = vpop.permute.xlu1 %1603 }
 0x238   : > { %v1606_v3 = vunpack.i.h.bf16 %v1604_v0  ;;  %v1605_v22 = vunpack.i.l.bf16 %v1604_v0  ;;  %v949_v8 = vsel %vm700_vm15, %v1600_v7, %v1601_v62 }
 0x23a   : > { %v960_v9 = vsel %vm708_vm2, %v1605_v22, %v1606_v3  ;;  %v1013_v10 = vsel %vm469_vm0, %v1601_v62, %v1606_v3 }
 0x23b   : > { %v1012_v11 = vsel %vm469_vm0, %v949_v8, %v960_v9 }
 0x23c   : > { %v1667_v13 = vpack.i.bf16 %v1013_v10, %v1012_v11  ;;  %v749_v11 = vld [vmem:[%s2482_s4] sm:$0xff] }
 0x23d   : > { %v1614_v14 = vpop.permute.xlu0 %1613 }
 0x23e   : > { %v1615_v15 = vunpack.i.l.bf16 %v1614_v14  ;;  %1668 = vrot.lane.b32.xlu1 %v1667_v13, %s2491_s12  ;;  %v1616_v16 = vunpack.i.h.bf16 %v1614_v14  ;;  %v750_v13 = vld [vmem:[%s2482_s4 + $0x8] sm:$0xff] }
 0x240   : > { %866 = vmatpush.msra.mxu3 %v1616_v16  ;;  %v810_v21 = vsel %vm801_vm4, %v1615_v15, %v1616_v16 }
 0x241   : > { %843 = vmatpush.msra.mxu2 %v810_v21  ;;  %v1619_v54 = vpop.permute.xlu1 %1618 }
 0x242   : > { %v1620_v2 = vunpack.i.l.bf16 %v1619_v54  ;;  %v1621_v38 = vunpack.i.h.bf16 %v1619_v54 }
 0x244   : > { %867 = vmatpush.msra.mxu3 %v1621_v38  ;;  %v809_v25 = vsel %vm801_vm4, %v1620_v2, %v1621_v38 }
 0x245   : > { %v1629_v18 = vpop.permute.xlu0 %1628  ;;  %844 = vmatpush.msra.mxu2 %v809_v25 }
 0x246   : > { %v1630_v27 = vunpack.i.l.bf16 %v1629_v18  ;;  %868 = vmatpush.msra.mxu3 %v1626_v24  ;;  %v1631_v29 = vunpack.i.h.bf16 %v1629_v18 }
 0x247   : > { %845 = vmatpush.msra.mxu2 %v808_v28 }
 0x248   : > { %869 = vmatpush.msra.mxu3 %v1631_v29  ;;  %v807_v34 = vsel %vm801_vm4, %v1630_v27, %v1631_v29 }
 0x249   : > { %v1634_v35 = vpop.permute.xlu1 %1633  ;;  %846 = vmatpush.msra.mxu2 %v807_v34 }
 0x24a   : > { %v1635_v37 = vunpack.i.l.bf16 %v1634_v35  ;;  %v1636_v5 = vunpack.i.h.bf16 %v1634_v35 }
 0x24c   : > { %870 = vmatpush.msra.mxu3 %v1636_v5  ;;  %v806_v39 = vsel %vm801_vm4, %v1635_v37, %v1636_v5  ;;  %v1018_v5 = vld [vmem:[%s2484_s6] sm:$0xff] }
 0x24d   : > { %847 = vmatpush.msra.mxu2 %v806_v39 }
 0x26d   : > { %v1649_v43 = vpop.permute.xlu0 %1648  ;;  %v1639_v47 = vpop.permute.xlu2 %1638 }
 0x26e   : > { %v1650_v48 = vunpack.i.l.bf16 %v1649_v43  ;;  %v1640_v49 = vunpack.i.l.bf16 %v1639_v47  ;;  %v1641_v52 = vunpack.i.h.bf16 %v1639_v47  ;;  %v1651_v55 = vunpack.i.h.bf16 %v1649_v43 }
 0x270   : > { %871 = vmatpush.msra.mxu3 %v1641_v52  ;;  %v805_v56 = vsel %vm801_vm4, %v1640_v49, %v1641_v52  ;;  %v804_v61 = vsel %vm801_vm4, %v1650_v48, %v1651_v55 }
 0x271   : > { %848 = vmatpush.msra.mxu2 %v805_v56 }
 0x272   : > { %872 = vmatpush.msra.mxu3 %v1651_v55 }
 0x273   : > { %849 = vmatpush.msra.mxu2 %v804_v61 }
 0x275   : > { %v1654_v62 = vpop.permute.xlu1 %1653  ;;  %v1644_v0 = vpop.permute.xlu2 %1643 }
 0x276   : > { %v1655_v7 = vunpack.i.l.bf16 %v1654_v62  ;;  %v1656_v3 = vunpack.i.h.bf16 %v1654_v62  ;;  %v1645_v22 = vunpack.i.l.bf16 %v1644_v0  ;;  %v1646_v8 = vunpack.i.h.bf16 %v1644_v0  ;;  %v1050_v17 = vpop.permute.xlu0 %1049 }
 0x278   : > { %873 = vmatpush.msra.mxu3 %v1656_v3  ;;  %v803_v9 = vsel %vm801_vm4, %v1655_v7, %v1656_v3  ;;  %v802_v10 = vsel %vm801_vm4, %v1645_v22, %v1646_v8 }
 0x279   : > { %850 = vmatpush.msra.mxu2 %v803_v9 }
 0x27a   : > { %874 = vmatpush.msra.mxu3 %v1646_v8 }
 0x27b   : > { %851 = vmatpush.msra.mxu2 %v802_v10  ;;  %1446 = vmatmul.msk.f32.vlgmr.msra.gmra.mxu3 %vm829_vm5, %v749_v11 }
 0x27c   : > { %1444 = vmatmul.msk.f32.vlgmr.msra.gmra.mxu2 %vm829_vm5, %v749_v11 }
 0x27d   : > { %v1659_v14 = vpop.permute.xlu2 %1658 }
 0x27e   : > { %v1660_v15 = vunpack.i.l.bf16 %v1659_v14  ;;  %v1661_v16 = vunpack.i.h.bf16 %v1659_v14 }
 0x280   : > { %v1056_v44 = vsel %vm801_vm4, %v1660_v15, %v1661_v16 }
 0x283   : > { %1447 = vmatmul.msk.f32.gmra.mxu3 %vm829_vm5, %v750_v13 }
 0x284   : > { %1445 = vmatmul.msk.f32.gmra.mxu2 %vm829_vm5, %v750_v13 }
 0x285   : > { %v1674_v18 = vpop.permute.xlu2 %1673 }
 0x286   : > { %v1675_v28 = vunpack.i.l.bf16 %v1674_v18  ;;  %v1676_v35 = vunpack.i.h.bf16 %v1674_v18 }
 0x288   : > { %v1053_v39 = vsel %vm801_vm4, %v1675_v28, %v1676_v35 }
 0x289   : > { %v1052_v21 = vpop.permute.xlu1 %1051 }
 0x28a   : > { %1450 = vmatpush.msk.msrb.mxu3 %vm469_vm0, %v1052_v21  ;;  %v1057_v54 = vsel %vm801_vm4, %v1050_v17, %v1052_v21 }
 0x28b   : > { %1448 = vmatpush.msk.msrb.mxu2 %vm469_vm0, %v1057_v54  ;;  %vm1066_vm0 = vcmask 293888  }
 0x28c   : > { %1106 = vmatpush.msrb.mxu3 %v1661_v16 }
 0x28d   : > { %1086 = vmatpush.msrb.mxu2 %v1056_v44 }
 0x296   : > { %v1664_v2 = vpop.permute.xlu0 %1663 }
 0x297   : > { %v1665_v38 = vunpack.i.l.bf16 %v1664_v2  ;;  %v1666_v24 = vunpack.i.h.bf16 %v1664_v2 }
 0x299   : > { %1107 = vmatpush.msrb.mxu3 %v1666_v24  ;;  %v1055_v25 = vsel %vm801_vm4, %v1665_v38, %v1666_v24 }
 0x29a   : > { %1087 = vmatpush.msrb.mxu2 %v1055_v25 }
 0x29e   : > { %v1023_v48 = vpop.permute.xlu0 %1022 }
 0x2b0   : > { %v1669_v27 = vpop.permute.xlu1 %1668 }
 0x2b1   : > { %v1670_v29 = vunpack.i.l.bf16 %v1669_v27  ;;  %v1671_v34 = vunpack.i.h.bf16 %v1669_v27 }
 0x2b3   : > { %1108 = vmatpush.msrb.mxu3 %v1671_v34  ;;  %v1054_v37 = vsel %vm801_vm4, %v1670_v29, %v1671_v34 }
 0x2b4   : > { %1088 = vmatpush.msrb.mxu2 %v1054_v37 }
 0x2b5   : > { %1109 = vmatpush.msrb.mxu3 %v1676_v35 }
 0x2b6   : > { %1089 = vmatpush.msrb.mxu2 %v1053_v39  ;;  %1451 = vmatmul.msk.f32.vlgmr.msrb.gmra.mxu3 %vm1066_vm0, %v1018_v5 }
 0x2b7   : > { %1449 = vmatmul.msk.f32.vlgmr.msrb.gmra.mxu2 %vm1066_vm0, %v1018_v5 }
 0x2fe   : > { %v2318_v61 = vpop.f32.mrf.mxu3 }
 0x2ff   : > { %v2313_v43 = vpop.f32.mrf.mxu2 }
 0x306   : > { %v2320_v62 = vpop.f32.mrf.mxu3 }
 0x307   : > { %v2315_v47 = vpop.f32.mrf.mxu2 }
 0x339   : > { %v1111_v7 = vpop.f32.mrf.mxu3 }
 0x33a   : > { %v1091_v49 = vpop.f32.mrf.mxu2  ;;  %v1112_v0 = vadd.f32 %v1111_v7, %v1023_v48 }
 0x33b   : > { %v1092_v52 = vadd.f32 %v1091_v49, %v1023_v48 }
 0x33c   : > { %v1115_v3 = vmax.f32 %v1112_v0, 0.0 }
 0x33d   : > { %v1114_v55 = vmax.f32 %v1092_v52, 0.0 }
 0x33e   : > { %v1117_v22 = vmin.f32 %v1115_v3, 6.0 }
 0x33f   : > { %v1116_v56 = vmin.f32 %v1114_v55, 6.0 }
 0x341   : > { %1118 = vrot.lane.b32.xlu1 %v1116_v56, %s1854_s28  ;;  %v1138_v10 = vmul.f32 %v1116_v56, %v2076_v45  ;;  %v1136_v13 = vmul.f32 %v1116_v56, %v2104_v63  ;;  %v1134_v21 = vmul.f32 %v1116_v56, %v2106_v1  ;;  %v1132_v45 = vmul.f32 %v1116_v56, %v2136_v19 }
 0x3b3   : > { %v1119_v8 = vpop.permute.xlu1 %1118 }
 0x3b4   : > { %v1120_v9 = vsel %vm567_vm3, %v1119_v8, %v1117_v22 }
 0x3b5   : > { %1121 = vrot.lane.b32.xlu2 %v1120_v9, %s1854_s28  ;;  %v1139_v11 = vmul.f32 %v1120_v9, %v2083_v51  ;;  %v1137_v14 = vmul.f32 %v1120_v9, %v2127_v12  ;;  %v1135_v17 = vmul.f32 %v1120_v9, %v2113_v6  ;;  %v1133_v44 = vmul.f32 %v1120_v9, %v2139_v20  ;;  %s2497_s28 = smov 120  }
 0x3b6   : > { %v1687_v51 = vpack.i.bf16 %v1117_v22, %v1116_v56  ;;  %v1126_v12 = vmul.f32 %v1120_v9, %v2183_v53  ;;  %v1130_v1 = vmul.f32 %v1120_v9, %v2159_v36  ;;  %v1128_v38 = vmul.f32 %v1120_v9, %v2161_v4 }
 0x3b7   : > { %v1677_v15 = vpack.i.bf16 %v1139_v11, %v1138_v10  ;;  %v1682_v16 = vpack.i.bf16 %v1137_v14, %v1136_v13  ;;  %v1692_v54 = vpack.i.bf16 %v1135_v17, %v1134_v21  ;;  %v1697_v63 = vpack.i.bf16 %v1133_v44, %v1132_v45  ;;  %v752_v21 = vld [vmem:[%s2483_s5 + $0x8] sm:$0xff] }
 0x3b8   : > { %v1124_v20 = vmul.f32 %v1120_v9, %v2238_v26 }
 0x3b9   : > { %1678 = vrot.lane.b32.xlu0 %v1677_v15, %s1855_s11  ;;  %1683 = vrot.lane.b32.xlu1 %v1682_v16, %s1857_s22  ;;  %s2498_s11 = smov 126   ;;  %s1460_s22 = sshll.u32 %s1836_s16, 6 }
 0x3bd   : > { %1693 = vrot.lane.b32.xlu2 %v1692_v54, %s1856_s20  ;;  %s2499_s20 = smov 73  }
 0x3c1   : > { %1688 = vrot.lane.b32.xlu1 %v1687_v51, %s1858_s24  ;;  %1698 = vrot.lane.b32.xlu0 %v1697_v63, %s1859_s27  ;;  %s1337_s27 = scalar_lea.hbm %s2488_s10, %s1460_s22 }
 0x3c2   : > { %s1340_s16 = sshll.u32 %s1337_s27, 4  ;;  %s1341_s16 = int_to_ptr.hbm [resolvable:$true] %s1340_s16 }
 0x3c3   : > { %s1780_s30 = sshra.s32 %s1341_s16, 4  ;;  %s1781_s30 = int_to_ptr.hbm [resolvable:$true] %s1780_s30 }
 0x3c4   : > { %s1782_s12 = scalar_lea.hbm %s1781_s30, 64  ;;  %p1787_p1 = scmp.lt.s32.totalorder %s1781_s30, %s2488_s10 }
 0x3c5   : > { %p1783_p12 = scmp.ne.s32.totalorder %s1781_s30, %s1782_s12 }
 0x3c7   : > { %p1784_p13 = pnand %p1783_p12, %p1961_p4 }
 0x3c9   : > { %p1785_p0 = pneg %p1784_p13 }
 0x40f   : > { %v1122_v6 = vpop.permute.xlu2 %1121 }
 0x410   : > { %v1123_v2 = vsel %vm567_vm3, %v1122_v6, %v1119_v8  ;;  %vm561_vm3 = vcmask 523264  }
 0x411   : > { %v1125_v24 = vmul.f32 %v1123_v2, %v2248_v57  ;;  %v1127_v19 = vmul.f32 %v1123_v2, %v2186_v58  ;;  %v1129_v25 = vmul.f32 %v1123_v2, %v2167_v41  ;;  %v1131_v18 = vmul.f32 %v1123_v2, %v2164_v40  ;;  %v404_v2 = vld [vmem:[%s2481_s3 + $0x18] sm:$0xff] }
 0x413   : > { %v1712_v27 = vpack.i.bf16 %v1127_v19, %v1126_v12  ;;  %v1702_v28 = vpack.i.bf16 %v1131_v18, %v1130_v1  ;;  %v1707_v29 = vpack.i.bf16 %v1129_v25, %v1128_v38  ;;  %v1757_v53 = vpack.i.bf16 %v1125_v24, %v1124_v20 }
 0x415   : > { %1713 = vrot.lane.b32.xlu1 %v1712_v27, %s1862_s21  ;;  %1703 = vrot.lane.b32.xlu2 %v1702_v28, %s2497_s28  ;;  %v751_v27 = vld [vmem:[%s2483_s5] sm:$0xff]  ;;  %s1425_s28 = sshll.u32 %s375_s19, 6 }
 0x416   : > { %1708 = vrot.lane.b32.xlu0 %v1707_v29, %s2498_s11  ;;  %v401_v28 = vld [vmem:[%s2481_s3] sm:$0xff]  ;;  %v403_v29 = vld [vmem:[%s2481_s3 + $0x10] sm:$0xff]  ;;  %s2417_s11 = scalar_lea.vmem [#allocation2], %s1425_s28 }
 0x417   : > { %v1694_v36 = vpop.permute.xlu2 %1693  ;;  %s1338_s21 = sshll.u32 %s2417_s11, 4  ;;  %s1339_s21 = int_to_ptr.vmem [resolvable:$true] %s1338_s21 }
 0x418   : > { %v1696_v4 = vunpack.i.h.bf16 %v1694_v36  ;;  %v1695_v26 = vunpack.i.l.bf16 %v1694_v36 }
 0x41a   : > { %v1181_v57 = vsel %vm731_vm11, %v1695_v26, %v1696_v4  ;;  %v406_v4 = vld [vmem:[%s2481_s3 + $0x28] sm:$0xff] }
 0x41b   : > { %v1732_v58 = vpack.i.bf16 %v1181_v57, %v1695_v26 }
 0x41d   : > { %1733 = vrot.lane.b32.xlu1 %v1732_v58, %s2499_s20  ;;  %v405_v58 = vld [vmem:[%s2481_s3 + $0x20] sm:$0xff] }
 0x42b   : > { %v1679_v41 = vpop.permute.xlu0 %1678  ;;  %v1684_v40 = vpop.permute.xlu1 %1683 }
 0x42c   : > { %v1681_v34 = vunpack.i.h.bf16 %v1679_v41  ;;  %v1680_v35 = vunpack.i.l.bf16 %v1679_v41  ;;  %v1686_v37 = vunpack.i.h.bf16 %v1684_v40  ;;  %v1685_v5 = vunpack.i.l.bf16 %v1684_v40 }
 0x42e   : > { %v1195_v39 = vsel %vm747_vm10, %v1680_v35, %v1681_v34  ;;  %v1188_v48 = vsel %vm739_vm12, %v1685_v5, %v1686_v37 }
 0x42f   : > { %v1717_v49 = vpack.i.bf16 %v1195_v39, %v1680_v35  ;;  %v1722_v52 = vpack.i.bf16 %v1188_v48, %v1685_v5 }
 0x431   : > { %1718 = vrot.lane.b32.xlu2 %v1717_v49, %s2499_s20  ;;  %1723 = vrot.lane.b32.xlu0 %v1722_v52, %s2499_s20 }
 0x433   : > { %v1689_v55 = vpop.permute.xlu1 %1688  ;;  %v1699_v56 = vpop.permute.xlu0 %1698 }
 0x434   : > { %v1691_v7 = vunpack.i.h.bf16 %v1689_v55  ;;  %v1690_v0 = vunpack.i.l.bf16 %v1689_v55  ;;  %v1701_v3 = vunpack.i.h.bf16 %v1699_v56  ;;  %v1700_v22 = vunpack.i.l.bf16 %v1699_v56 }
 0x436   : > { %v1167_v8 = vsel %vm582_vm14, %v1690_v0, %v1691_v7  ;;  %v1174_v9 = vsel %vm723_vm13, %v1700_v22, %v1701_v3 }
 0x437   : > { %v1727_v10 = vpack.i.bf16 %v1167_v8, %v1690_v0  ;;  %v1737_v11 = vpack.i.bf16 %v1174_v9, %v1700_v22 }
 0x439   : > { %1728 = vrot.lane.b32.xlu0 %v1727_v10, %s2499_s20  ;;  %1738 = vrot.lane.b32.xlu2 %v1737_v11, %s2499_s20 }
 0x46f   : > { %v1704_v13 = vpop.permute.xlu2 %1703 }
 0x470   : > { %v1706_v14 = vunpack.i.h.bf16 %v1704_v13  ;;  %v1705_v15 = vunpack.i.l.bf16 %v1704_v13 }
 0x472   : > { %v1160_v16 = vsel %vm708_vm2, %v1705_v15, %v1706_v14 }
 0x473   : > { %v1742_v17 = vpack.i.bf16 %v1706_v14, %v1160_v16 }
 0x475   : > { %1743 = vrot.lane.b32.xlu1 %v1742_v17, %s2499_s20 }
 0x47d   : > { %1758 = vrot.lane.b32.xlu1 %v1757_v53, %s2499_s20  ;;  %v1197_v53 = vld [vmem:[%s2487_s9] sm:$0xff] }
 0x485   : > { %760 = vperm.xlu1 %1763, %v752_v21  }
 0x487   : > { %v1714_v54 = vpop.permute.xlu1 %1713 }
 0x488   : > { %v1716_v44 = vunpack.i.h.bf16 %v1714_v54  ;;  %v1715_v45 = vunpack.i.l.bf16 %v1714_v54  ;;  %v1709_v51 = vpop.permute.xlu0 %1708 }
 0x489   : > { %v1711_v63 = vunpack.i.h.bf16 %v1709_v51  ;;  %v1710_v6 = vunpack.i.l.bf16 %v1709_v51 }
 0x48a   : > { %v1146_v12 = vsel %vm692_vm1, %v1715_v45, %v1716_v44 }
 0x48b   : > { %v1752_v1 = vpack.i.bf16 %v1716_v44, %v1146_v12  ;;  %v1153_v38 = vsel %vm700_vm15, %v1710_v6, %v1711_v63  ;;  %v1719_v20 = vpop.permute.xlu2 %1718 }
 0x48c   : > { %v1747_v24 = vpack.i.bf16 %v1711_v63, %v1153_v38  ;;  %v1721_v19 = vunpack.i.h.bf16 %v1719_v20  ;;  %v1720_v25 = vunpack.i.l.bf16 %v1719_v20 }
 0x48d   : > { %425 = vperm.xlu1 %1763, %v404_v2   ;;  %1753 = vrot.lane.b32.xlu0 %v1752_v1, %s2499_s20 }
 0x48e   : > { %1748 = vrot.lane.b32.xlu2 %v1747_v24, %s2499_s20  ;;  %1298 = vmatpush.msra.mxu3 %v1721_v19  ;;  %v1249_v18 = vsel %vm801_vm4, %v1720_v25, %v1721_v19  ;;  %s1786_s20 = scalar_lea.hbm %s2488_s10, 128 }
 0x48f   : > { %1278 = vmatpush.msra.mxu2 %v1249_v18  ;;  %v1734_v36 = vpop.permute.xlu1 %1733  ;;  %p1788_p2 = scmp.lt.s32.totalorder %s1786_s20, %s1782_s12 }
 0x490   : > { %v1736_v41 = vunpack.i.h.bf16 %v1734_v36  ;;  %v1735_v40 = vunpack.i.l.bf16 %v1734_v36 }
 0x491   : > { %p1789_p3 = por %p1788_p2, %p1787_p1 }
 0x492   : > { %v1247_v48 = vsel %vm801_vm4, %v1735_v40, %v1736_v41 }
 0x493   : > { %v1739_v26 = vpop.permute.xlu2 %1738  ;;  %p1790_p5 = pnand %p1789_p3, %p1785_p0 }
 0x494   : > { %v1741_v37 = vunpack.i.h.bf16 %v1739_v26  ;;  %v1740_v5 = vunpack.i.l.bf16 %v1739_v26 }
 0x495   : > { %755 = vperm.xlu0 %1536, %v751_v27  }
 0x496   : > { %410 = vperm.xlu2 %1762, %v401_v28   ;;  %v1246_v49 = vsel %vm801_vm4, %v1740_v5, %v1741_v37 }
 0x49d   : > { %420 = vperm.xlu0 %1536, %v403_v29  }
 0x49e   : > { %1200 = vperm.xlu2 %1762, %v1197_v53  }
 0x4a3   : > { %v1724_v57 = vpop.permute.xlu0 %1723 }
 0x4a4   : > { %v1726_v34 = vunpack.i.h.bf16 %v1724_v57  ;;  %v1725_v35 = vunpack.i.l.bf16 %v1724_v57 }
 0x4a5   : > { %435 = vperm.xlu0 %1536, %v406_v4  }
 0x4a6   : > { %430 = vperm.xlu2 %1762, %v405_v58   ;;  %1299 = vmatpush.msra.mxu3 %v1726_v34  ;;  %v1248_v39 = vsel %vm801_vm4, %v1725_v35, %v1726_v34 }
 0x4a7   : > { %1279 = vmatpush.msra.mxu2 %v1248_v39 }
 0x4a8   : > { %1300 = vmatpush.msra.mxu3 %v1736_v41 }
 0x4a9   : > { %1280 = vmatpush.msra.mxu2 %v1247_v48 }
 0x4aa   : > { %1301 = vmatpush.msra.mxu3 %v1741_v37 }
 0x4ab   : > { %v1729_v52 = vpop.permute.xlu0 %1728  ;;  %1281 = vmatpush.msra.mxu2 %v1246_v49 }
 0x4ac   : > { %v1731_v55 = vunpack.i.h.bf16 %v1729_v52  ;;  %v1730_v56 = vunpack.i.l.bf16 %v1729_v52 }
 0x4ae   : > { %1302 = vmatpush.msra.mxu3 %v1731_v55  ;;  %v1245_v7 = vsel %vm801_vm4, %v1730_v56, %v1731_v55 }
 0x4af   : > { %1282 = vmatpush.msra.mxu2 %v1245_v7 }
 0x4e7   : > { %v1744_v0 = vpop.permute.xlu1 %1743 }
 0x4e8   : > { %v1746_v3 = vunpack.i.h.bf16 %v1744_v0  ;;  %v1745_v22 = vunpack.i.l.bf16 %v1744_v0  ;;  %v1749_v8 = vpop.permute.xlu2 %1748 }
 0x4e9   : > { %v1751_v9 = vunpack.i.h.bf16 %v1749_v8  ;;  %v1750_v10 = vunpack.i.l.bf16 %v1749_v8 }
 0x4ea   : > { %1303 = vmatpush.msra.mxu3 %v1746_v3  ;;  %v1244_v11 = vsel %vm801_vm4, %v1745_v22, %v1746_v3 }
 0x4eb   : > { %1283 = vmatpush.msra.mxu2 %v1244_v11  ;;  %v1243_v13 = vsel %vm801_vm4, %v1750_v10, %v1751_v9 }
 0x4ec   : > { %1304 = vmatpush.msra.mxu3 %v1751_v9 }
 0x4ed   : > { %1284 = vmatpush.msra.mxu2 %v1243_v13 }
 0x4ef   : > { %v1759_v14 = vpop.permute.xlu1 %1758 }
 0x4f0   : > { %v411_v15 = vpop.permute.xlu2 %410  ;;  %v1761_v63 = vunpack.i.h.bf16 %v1759_v14  ;;  %v1760_v6 = vunpack.i.l.bf16 %v1759_v14 }
 0x4f2   : > { %v1241_v27 = vsel %vm801_vm4, %v1760_v6, %v1761_v63 }
 0x4f7   : > { %v761_v16 = vpop.permute.xlu1 %760 }
 0x4f8   : > { %v2397_v17 = vpop.permute.xlu2 %1200  ;;  %v857_v21 = vadd.f32 %v2315_v47, %v761_v16  ;;  %v880_v54 = vadd.f32 %v2320_v62, %v761_v16  ;;  %v1196_v62 = vld [vmem:[%s2486_s8] sm:$0xff] }
 0x4fa   : > { %v884_v44 = vmax.f32 %v857_v21, 0.0  ;;  %v885_v45 = vmax.f32 %v880_v54, 0.0 }
 0x4fc   : > { %v888_v38 = vmin.f32 %v884_v44, 6.0  ;;  %v889_v20 = vmin.f32 %v885_v45, 6.0 }
 0x4ff   : > { %v1754_v51 = vpop.permute.xlu0 %1753  ;;  %v426_v58 = vpop.permute.xlu1 %425 }
 0x500   : > { %v1756_v12 = vunpack.i.h.bf16 %v1754_v51  ;;  %v1755_v2 = vunpack.i.l.bf16 %v1754_v51  ;;  %v431_v1 = vpop.permute.xlu2 %430  ;;  %v539_v35 = vadd.f32 %v2080_v50, %v426_v58 }
 0x501   : > { %v504_v24 = vadd.f32 %v2060_v32, %v431_v1  ;;  %v542_v19 = vadd.f32 %v2099_v59, %v431_v1  ;;  %v492_v32 = vadd.f32 %v2048_v23, %v411_v15  ;;  %v530_v59 = vadd.f32 %v2072_v42, %v411_v15 }
 0x502   : > { %1305 = vmatpush.msra.mxu3 %v1756_v12  ;;  %v1242_v47 = vsel %vm801_vm4, %v1755_v2, %v1756_v12  ;;  %v501_v42 = vadd.f32 %v2058_v31, %v426_v58 }
 0x503   : > { %v892_v25 = vadd.f32 %v888_v38, %v504_v24  ;;  %v893_v18 = vadd.f32 %v889_v20, %v542_v19  ;;  %1285 = vmatpush.msra.mxu2 %v1242_v47  ;;  %v550_v23 = vmax.f32 %v492_v32, 0.0  ;;  %v551_v34 = vmax.f32 %v530_v59, 0.0 }
 0x504   : > { %1306 = vmatpush.msra.mxu3 %v1761_v63 }
 0x505   : > { %v896_v28 = vmax.f32 %v892_v25, 0.0  ;;  %v897_v29 = vmax.f32 %v893_v18, 0.0  ;;  %1286 = vmatpush.msra.mxu2 %v1241_v27  ;;  %1453 = vmatmul.msk.f32.vlgmr.msra.gmra.mxu3 %vm829_vm5, %v1196_v62  ;;  %v552_v39 = vmin.f32 %v550_v23, 6.0  ;;  %v553_v48 = vmin.f32 %v551_v34, 6.0 }
 0x506   : > { %1452 = vmatmul.msk.f32.vlgmr.msra.gmra.mxu2 %vm829_vm5, %v1196_v62 }
 0x507   : > { %v900_v53 = vmin.f32 %v896_v28, 6.0  ;;  %v901_v36 = vmin.f32 %v897_v29, 6.0  ;;  %v756_v4 = vpop.permute.xlu0 %755 }
 0x508   : > { %v854_v26 = vadd.f32 %v2313_v43, %v756_v4  ;;  %v877_v57 = vadd.f32 %v2318_v61, %v756_v4 }
 0x509   : > { %904 = vst [vmem:[%s2417_s11 + $0x20] sm:$0xff] %v900_v53 }
 0x50a   : > { %905 = vst.msk [vmem:[%s2417_s11 + $0x28] sm:$0xff] %vm561_vm3, %v901_v36  ;;  %v882_v41 = vmax.f32 %v854_v26, 0.0  ;;  %v883_v40 = vmax.f32 %v877_v57, 0.0 }
 0x50c   : > { %v886_v43 = vmin.f32 %v882_v41, 6.0  ;;  %v887_v37 = vmin.f32 %v883_v40, 6.0 }
 0x50e   : > { %v890_v61 = vadd.f32 %v886_v43, %v501_v42  ;;  %v891_v5 = vadd.f32 %v887_v37, %v539_v35 }
 0x50f   : > { %v421_v49 = vpop.permute.xlu0 %420 }
 0x510   : > { %v894_v52 = vmax.f32 %v890_v61, 0.0  ;;  %v895_v55 = vmax.f32 %v891_v5, 0.0  ;;  %v498_v56 = vadd.f32 %v2056_v30, %v421_v49  ;;  %v536_v7 = vadd.f32 %v2078_v46, %v421_v49 }
 0x512   : > { %v898_v31 = vmin.f32 %v894_v52, 6.0  ;;  %v899_v0 = vmin.f32 %v895_v55, 6.0  ;;  %v554_v50 = vadd.f32 %v552_v39, %v498_v56  ;;  %v555_v3 = vadd.f32 %v553_v48, %v536_v7 }
 0x514   : > { %902 = vst [vmem:[%s2417_s11 + $0x10] sm:$0xff] %v898_v31  ;;  %v556_v22 = vmax.f32 %v554_v50, 0.0  ;;  %v557_v8 = vmax.f32 %v555_v3, 0.0 }
 0x515   : > { %903 = vst.msk [vmem:[%s2417_s11 + $0x18] sm:$0xff] %vm561_vm3, %v899_v0 }
 0x516   : > { %v558_v9 = vmin.f32 %v556_v22, 6.0  ;;  %v559_v10 = vmin.f32 %v557_v8, 6.0 }
 0x517   : > { %v436_v13 = vpop.permute.xlu0 %435 }
 0x518   : > { %560 = vst [vmem:[%s2417_s11] sm:$0xff] %v558_v9  ;;  %v545_v21 = vadd.f32 %v2102_v60, %v436_v13  ;;  %v507_v44 = vadd.f32 %v2062_v33, %v436_v13 }
 0x519   : > { %562 = vst.msk [vmem:[%s2417_s11 + $0x8] sm:$0xff] %vm561_vm3, %v559_v10 }
 0x588   : > { %v1308_v11 = vpop.f32.mrf.mxu3 }
 0x589   : > { %v1309_v30 = vadd.f32 %v1308_v11, %v2397_v17  ;;  %v1288_v46 = vpop.f32.mrf.mxu2 }
 0x58a   : > { %v1289_v14 = vadd.f32 %v1288_v46, %v2397_v17 }
 0x58b   : > { %v1312_v15 = vmax.f32 %v1309_v30, 0.0 }
 0x58c   : > { %v1311_v16 = vmax.f32 %v1289_v14, 0.0 }
 0x58d   : > { %v1314_v54 = vmin.f32 %v1312_v15, 6.0 }
 0x58e   : > { %v1313_v45 = vmin.f32 %v1311_v16, 6.0 }
 0x58f   : > { %v1316_v51 = vadd.f32 %v1314_v54, %v545_v21 }
 0x590   : > { %v1315_v63 = vadd.f32 %v1313_v45, %v507_v44 }
 0x591   : > { %v1318_v17 = vmax.f32 %v1316_v51, 0.0 }
 0x592   : > { %v1317_v6 = vmax.f32 %v1315_v63, 0.0 }
 0x593   : > { %v1320_v12 = vmin.f32 %v1318_v17, 6.0 }
 0x594   : > { %v1319_v60 = vmin.f32 %v1317_v6, 6.0 }
 0x595   : > { %1322 = vst.msk [vmem:[%s2417_s11 + $0x38] sm:$0xff] %vm561_vm3, %v1320_v12 }
 0x596   : > { %1321 = vst [vmem:[%s2417_s11 + $0x30] sm:$0xff] %v1319_v60 }
 0x597   : > { %1793 = shalt.err (!%p1790_p5)
}
 0x598   : > { %s1864_s19 = smov 256   ;;  %s1865_s11 = smov 16  }
 0x599   : > { %1461 = dma.vmem_to_hbm [thread:$0]  (%p1961_p4), %s1339_s21, 1024, %s1341_s16, %s1324_s29, %s1864_s19, %s1864_s19, %s1865_s11  }
 0x59a PF: > { %p1467_p6 = scmp.ge.s32.totalorder %s1844_s18, 2  ;;  %s1355_s28 = sand.u32 1, %s1824_s13  }
 0x59b   : > { %s1356_s22 = scalar_lea.sflag [#allocation3], %s1355_s28 }
 0x59c   : > { %p1464_p7 = pnand %p1467_p6, %p1968_p8 }
 0x59e   : > { %p1465_p9 = pneg %p1464_p7 }
 0x5a0   : > { %1819 = dma.done.wait (%p1465_p9), %s1356_s22, 1024  }
 0x5a1   : > { %1821 = vsyncadd (%p1465_p9), %s1356_s22, 4294966272  ;;  %s23_s18 = sadd.s32 1, %s1844_s18   ;;  %s2500_s23 = sld [smem:[#allocation5_spill]] }
 0x5a2   : > { %p20_p10 = scmp.ge.s32.totalorder %s23_s18, 4   ;;  %s2501_s13 = smov %s1828_s14 }
 0x5a3   : > { %s2502_s14 = smov %s1832_s15  ;;  %s2503_s15 = smov %s1974_s26 }
 0x5a4   : > { %s2504_s16 = smov %s1840_s17  ;;  %22 = sbr.rel (!%p20_p10) target bundleno = 4 (0x4), region = 95 }
 0x5a7   : > { %s2505_s17 = smov %s2500_s23 }
 0x5a9   :  { %1362 = vsyncpa [#allocation3], 1 }
 0x5aa   :  { %1364 = vsyncpa [#allocation3 + $0x1], 1 }

</bundles_post_ra>
